<compile_context>
chip_gen: v7x
topology: tpu7x:2x2x1
jax: 0.10.0
libtpu: 0.0.40
codegen_flags: <defaults>
</compile_context>

<pallas_src>
import functools

import jax
import jax.numpy as jnp
from jax import lax
from jax.experimental import pallas as pl
from jax.experimental.pallas import tpu as pltpu


def _spatial_attention_kernel(x_ref, w_ref, b_ref, o_ref, pack_ref, *,
                              C, H, W, K, P, B_sub, n_sub, Wp):
    # x_ref    : (B_step, C, H, W) VMEM  -- natural layout, B_step = B_sub*n_sub
    # w_ref    : (2*K*K,) SMEM           -- conv weight, pre-divided by (1-lamda)
    # b_ref    : (1,)     SMEM           -- conv bias,   pre-divided by (1-lamda)
    # o_ref    : (B_step, 1, H, W) VMEM  -- natural output layout
    # pack_ref : (2, Hp_pad, B_sub*Wp) VMEM scratch -- lane-packed, zero-padded
    #            pooled planes; sample b's data sits at rows [P, P+H),
    #            lanes [b*Wp+P, b*Wp+P+W).
    Lb = B_sub * Wp
    Wout = Lb - 2 * P

    # Hoisted scalar parameter reads (SMEM).
    w = [w_ref[i] for i in range(2 * K * K)]
    bias = b_ref[0]

    # Zero the packed-plane scratch once per invocation.  Only the pad rows /
    # inter-sample gap lanes must stay zero; every data window below is fully
    # overwritten for every sub-slab, so this is safe across grid steps and
    # per-core scratch copies alike.
    pack_ref[...] = jnp.zeros_like(pack_ref)

    for sub in range(n_sub):
        base = sub * B_sub

        # ---- channel mean / max pooling + ReLU, packed along lanes --------
        for b in range(B_sub):
            x0 = x_ref[base + b, 0].astype(jnp.float32)           # (H, W)
            s = x0
            m = x0
            for c in range(1, C):
                xc = x_ref[base + b, c].astype(jnp.float32)
                s = s + xc
                m = jnp.maximum(m, xc)
            col = b * Wp + P
            pack_ref[0, P:P + H, col:col + W] = jnp.maximum(s * (1.0 / C), 0.0)
            pack_ref[1, P:P + H, col:col + W] = jnp.maximum(m, 0.0)

        # ---- 7x7 conv (2 in -> 1 out), dx-hoisted shift-and-accumulate ----
        # 2*K*K mul+adds over the full packed width (VALU), but only 2*K band
        # reads + K lane slices of shift work instead of 2*K*K lane shifts.
        acc_dx = [jnp.zeros((H, Lb), jnp.float32) for _ in range(K)]
        for ci in range(2):
            for dy in range(K):
                band = pack_ref[ci, dy:dy + H, :]                  # (H, Lb)
                for dx in range(K):
                    acc_dx[dx] = acc_dx[dx] + w[ci * K * K + dy * K + dx] * band
        acc = jnp.full((H, Wout), bias, dtype=jnp.float32)
        for dx in range(K):
            acc = acc + acc_dx[dx][:, dx:dx + Wout]                # K lane slices

        # ---- scatter straight into the natural (B,1,H,W) output layout ----
        for b in range(B_sub):
            o_ref[base + b, 0] = acc[:, b * Wp:b * Wp + W].astype(o_ref.dtype)


def spatial_attention(x, weight, bias, lamda, kernel_size=7,
                      block_batch=None, slabs_per_step=None):
    """x: (N, C, H, W); weight: (1, 2, K, K); bias: (1,); lamda: scalar."""
    N, C, H, W = x.shape
    K = kernel_size
    P = (K - 1) // 2
    Wp = W + 2 * P
    Hp = H + 2 * P
    Hp_pad = ((Hp + 7) // 8) * 8          # sublane-tile aligned scratch rows

    # Fold ConvSNP's 1/(1 - lamda) scale into the conv parameters (exact).
    inv = 1.0 / (1.0 - jnp.asarray(lamda, jnp.float32))
    w_flat = (weight.astype(jnp.float32) * inv).reshape(-1)        # (2*K*K,)
    b_arr = jnp.reshape(bias, (1,)).astype(jnp.float32) * inv      # (1,)

    # Samples packed side-by-side along lanes per slab: ~2 lane tiles keeps
    # the conv's live values (K dx-accumulators + band + acc) inside the
    # 64-vreg file.  Several slabs per grid step amortize the ~0.35 us
    # per-step overhead without raising vreg pressure.
    if block_batch is None:
        B_sub = max(1, min(N, (2 * 128) // Wp))
    else:
        B_sub = max(1, min(N, block_batch))
    if slabs_per_step is None:
        n_sub = max(1, min(pl.cdiv(N, B_sub), 4))
    else:
        n_sub = max(1, int(slabs_per_step))
    B_step = B_sub * n_sub
    G = pl.cdiv(N, B_step)
    Npad = G * B_step
    if Npad != N:
        x = jnp.pad(x, ((0, Npad - N), (0, 0), (0, 0), (0, 0)))

    kernel = functools.partial(_spatial_attention_kernel,
                               C=C, H=H, W=W, K=K, P=P,
                               B_sub=B_sub, n_sub=n_sub, Wp=Wp)

    out = pl.pallas_call(
        kernel,
        out_shape=jax.ShapeDtypeStruct((Npad, 1, H, W), x.dtype),
        grid=(G,),
        in_specs=[
            pl.BlockSpec((B_step, C, H, W), lambda g: (g, 0, 0, 0)),
            pl.BlockSpec(memory_space=pltpu.MemorySpace.SMEM),
            pl.BlockSpec(memory_space=pltpu.MemorySpace.SMEM),
        ],
        out_specs=pl.BlockSpec((B_step, 1, H, W), lambda g: (g, 0, 0, 0)),
        scratch_shapes=[pltpu.VMEM((2, Hp_pad, B_sub * Wp), jnp.float32)],
        compiler_params=pltpu.CompilerParams(
            dimension_semantics=("parallel",),
            vmem_limit_bytes=32 * 1024 * 1024),
    )(x, w_flat, b_arr)

    return out[:N]


def _reference(x, weight, bias, lamda):
    avg = jnp.mean(x, axis=1, keepdims=True)
    mx = jnp.max(x, axis=1, keepdims=True)
    cat = jnp.concatenate([avg, mx], axis=1)
    cat = jax.nn.relu(cat)
    pad = (weight.shape[-1] - 1) // 2
    y = lax.conv_general_dilated(
        cat, weight, window_strides=(1, 1),
        padding=[(pad, pad), (pad, pad)],
        dimension_numbers=("NCHW", "OIHW", "NCHW"))
    y = y + bias.reshape(1, 1, 1, 1)
    return y / (1.0 - lamda)


if __name__ == "__main__":
    key = jax.random.PRNGKey(0)
    kx, kw, kb = jax.random.split(key, 3)

    N, C, H, W = 2, 4, 16, 16
    K = 7

    x = jax.random.normal(kx, (N, C, H, W), dtype=jnp.float32)
    # Deterministic synthetic parameters (Conv2d(2,1,7,padding=3) + ConvSNP lamda_)
    weight = 0.1 * jax.random.normal(kw, (1, 2, K, K), dtype=jnp.float32)
    bias = 0.1 * jax.random.normal(kb, (1,), dtype=jnp.float32)
    lamda = jnp.float32(0.001)

    out = spatial_attention(x, weight, bias, lamda, kernel_size=K)
    out = jax.block_until_ready(out)

    ref = jax.block_until_ready(_reference(x, weight, bias, lamda))
    assert out.shape == (N, 1, H, W), out.shape
    if not jnp.allclose(out, ref, atol=1e-3, rtol=1e-3):
        raise AssertionError("Pallas kernel does not match reference")

    print("KERNEL_OK")
</pallas_src>

<mosaic_0001>
module attributes {stable_mosaic.version = 11 : i64} {
  func.func @_spatial_attention_kernel(%arg0: i32, %arg1: memref<2x4x16x16xf32, #tpu.memory_space<vmem>>, %arg2: memref<98xf32, #tpu.memory_space<smem>>, %arg3: memref<1xf32, #tpu.memory_space<smem>>, %arg4: memref<2x1x16x16xf32, #tpu.memory_space<vmem>>, %arg5: memref<2x24x44xf32, #tpu.memory_space<vmem>>) attributes {dimension_semantics = [#tpu.dimension_semantics<parallel>], iteration_bounds = array<i64: 1>, scalar_prefetch = 0 : i64, scratch_operands = 1 : i64, tpu.core_type = #tpu.core_type<tc>, window_params = [{transform_indices = @transform_0, window_bounds = array<i64: 2, 4, 16, 16>}, {transform_indices = @transform_1, window_bounds = array<i64: 98>}, {transform_indices = @transform_2, window_bounds = array<i64: 1>}, {transform_indices = @transform_3, window_bounds = array<i64: 2, 1, 16, 16>}]} {
    %c0 = arith.constant 0 : index
    %0 = memref.load %arg2[%c0] : memref<98xf32, #tpu.memory_space<smem>>
    %c1 = arith.constant 1 : index
    %1 = memref.load %arg2[%c1] : memref<98xf32, #tpu.memory_space<smem>>
    %c2 = arith.constant 2 : index
    %2 = memref.load %arg2[%c2] : memref<98xf32, #tpu.memory_space<smem>>
    %c3 = arith.constant 3 : index
    %3 = memref.load %arg2[%c3] : memref<98xf32, #tpu.memory_space<smem>>
    %c4 = arith.constant 4 : index
    %4 = memref.load %arg2[%c4] : memref<98xf32, #tpu.memory_space<smem>>
    %c5 = arith.constant 5 : index
    %5 = memref.load %arg2[%c5] : memref<98xf32, #tpu.memory_space<smem>>
    %c6 = arith.constant 6 : index
    %6 = memref.load %arg2[%c6] : memref<98xf32, #tpu.memory_space<smem>>
    %c7 = arith.constant 7 : index
    %7 = memref.load %arg2[%c7] : memref<98xf32, #tpu.memory_space<smem>>
    %c8 = arith.constant 8 : index
    %8 = memref.load %arg2[%c8] : memref<98xf32, #tpu.memory_space<smem>>
    %c9 = arith.constant 9 : index
    %9 = memref.load %arg2[%c9] : memref<98xf32, #tpu.memory_space<smem>>
    %c10 = arith.constant 10 : index
    %10 = memref.load %arg2[%c10] : memref<98xf32, #tpu.memory_space<smem>>
    %c11 = arith.constant 11 : index
    %11 = memref.load %arg2[%c11] : memref<98xf32, #tpu.memory_space<smem>>
    %c12 = arith.constant 12 : index
    %12 = memref.load %arg2[%c12] : memref<98xf32, #tpu.memory_space<smem>>
    %c13 = arith.constant 13 : index
    %13 = memref.load %arg2[%c13] : memref<98xf32, #tpu.memory_space<smem>>
    %c14 = arith.constant 14 : index
    %14 = memref.load %arg2[%c14] : memref<98xf32, #tpu.memory_space<smem>>
    %c15 = arith.constant 15 : index
    %15 = memref.load %arg2[%c15] : memref<98xf32, #tpu.memory_space<smem>>
    %c16 = arith.constant 16 : index
    %16 = memref.load %arg2[%c16] : memref<98xf32, #tpu.memory_space<smem>>
    %c17 = arith.constant 17 : index
    %17 = memref.load %arg2[%c17] : memref<98xf32, #tpu.memory_space<smem>>
    %c18 = arith.constant 18 : index
    %18 = memref.load %arg2[%c18] : memref<98xf32, #tpu.memory_space<smem>>
    %c19 = arith.constant 19 : index
    %19 = memref.load %arg2[%c19] : memref<98xf32, #tpu.memory_space<smem>>
    %c20 = arith.constant 20 : index
    %20 = memref.load %arg2[%c20] : memref<98xf32, #tpu.memory_space<smem>>
    %c21 = arith.constant 21 : index
    %21 = memref.load %arg2[%c21] : memref<98xf32, #tpu.memory_space<smem>>
    %c22 = arith.constant 22 : index
    %22 = memref.load %arg2[%c22] : memref<98xf32, #tpu.memory_space<smem>>
    %c23 = arith.constant 23 : index
    %23 = memref.load %arg2[%c23] : memref<98xf32, #tpu.memory_space<smem>>
    %c24 = arith.constant 24 : index
    %24 = memref.load %arg2[%c24] : memref<98xf32, #tpu.memory_space<smem>>
    %c25 = arith.constant 25 : index
    %25 = memref.load %arg2[%c25] : memref<98xf32, #tpu.memory_space<smem>>
    %c26 = arith.constant 26 : index
    %26 = memref.load %arg2[%c26] : memref<98xf32, #tpu.memory_space<smem>>
    %c27 = arith.constant 27 : index
    %27 = memref.load %arg2[%c27] : memref<98xf32, #tpu.memory_space<smem>>
    %c28 = arith.constant 28 : index
    %28 = memref.load %arg2[%c28] : memref<98xf32, #tpu.memory_space<smem>>
    %c29 = arith.constant 29 : index
    %29 = memref.load %arg2[%c29] : memref<98xf32, #tpu.memory_space<smem>>
    %c30 = arith.constant 30 : index
    %30 = memref.load %arg2[%c30] : memref<98xf32, #tpu.memory_space<smem>>
    %c31 = arith.constant 31 : index
    %31 = memref.load %arg2[%c31] : memref<98xf32, #tpu.memory_space<smem>>
    %c32 = arith.constant 32 : index
    %32 = memref.load %arg2[%c32] : memref<98xf32, #tpu.memory_space<smem>>
    %c33 = arith.constant 33 : index
    %33 = memref.load %arg2[%c33] : memref<98xf32, #tpu.memory_space<smem>>
    %c34 = arith.constant 34 : index
    %34 = memref.load %arg2[%c34] : memref<98xf32, #tpu.memory_space<smem>>
    %c35 = arith.constant 35 : index
    %35 = memref.load %arg2[%c35] : memref<98xf32, #tpu.memory_space<smem>>
    %c36 = arith.constant 36 : index
    %36 = memref.load %arg2[%c36] : memref<98xf32, #tpu.memory_space<smem>>
    %c37 = arith.constant 37 : index
    %37 = memref.load %arg2[%c37] : memref<98xf32, #tpu.memory_space<smem>>
    %c38 = arith.constant 38 : index
    %38 = memref.load %arg2[%c38] : memref<98xf32, #tpu.memory_space<smem>>
    %c39 = arith.constant 39 : index
    %39 = memref.load %arg2[%c39] : memref<98xf32, #tpu.memory_space<smem>>
    %c40 = arith.constant 40 : index
    %40 = memref.load %arg2[%c40] : memref<98xf32, #tpu.memory_space<smem>>
    %c41 = arith.constant 41 : index
    %41 = memref.load %arg2[%c41] : memref<98xf32, #tpu.memory_space<smem>>
    %c42 = arith.constant 42 : index
    %42 = memref.load %arg2[%c42] : memref<98xf32, #tpu.memory_space<smem>>
    %c43 = arith.constant 43 : index
    %43 = memref.load %arg2[%c43] : memref<98xf32, #tpu.memory_space<smem>>
    %c44 = arith.constant 44 : index
    %44 = memref.load %arg2[%c44] : memref<98xf32, #tpu.memory_space<smem>>
    %c45 = arith.constant 45 : index
    %45 = memref.load %arg2[%c45] : memref<98xf32, #tpu.memory_space<smem>>
    %c46 = arith.constant 46 : index
    %46 = memref.load %arg2[%c46] : memref<98xf32, #tpu.memory_space<smem>>
    %c47 = arith.constant 47 : index
    %47 = memref.load %arg2[%c47] : memref<98xf32, #tpu.memory_space<smem>>
    %c48 = arith.constant 48 : index
    %48 = memref.load %arg2[%c48] : memref<98xf32, #tpu.memory_space<smem>>
    %c49 = arith.constant 49 : index
    %49 = memref.load %arg2[%c49] : memref<98xf32, #tpu.memory_space<smem>>
    %c50 = arith.constant 50 : index
    %50 = memref.load %arg2[%c50] : memref<98xf32, #tpu.memory_space<smem>>
    %c51 = arith.constant 51 : index
    %51 = memref.load %arg2[%c51] : memref<98xf32, #tpu.memory_space<smem>>
    %c52 = arith.constant 52 : index
    %52 = memref.load %arg2[%c52] : memref<98xf32, #tpu.memory_space<smem>>
    %c53 = arith.constant 53 : index
    %53 = memref.load %arg2[%c53] : memref<98xf32, #tpu.memory_space<smem>>
    %c54 = arith.constant 54 : index
    %54 = memref.load %arg2[%c54] : memref<98xf32, #tpu.memory_space<smem>>
    %c55 = arith.constant 55 : index
    %55 = memref.load %arg2[%c55] : memref<98xf32, #tpu.memory_space<smem>>
    %c56 = arith.constant 56 : index
    %56 = memref.load %arg2[%c56] : memref<98xf32, #tpu.memory_space<smem>>
    %c57 = arith.constant 57 : index
    %57 = memref.load %arg2[%c57] : memref<98xf32, #tpu.memory_space<smem>>
    %c58 = arith.constant 58 : index
    %58 = memref.load %arg2[%c58] : memref<98xf32, #tpu.memory_space<smem>>
    %c59 = arith.constant 59 : index
    %59 = memref.load %arg2[%c59] : memref<98xf32, #tpu.memory_space<smem>>
    %c60 = arith.constant 60 : index
    %60 = memref.load %arg2[%c60] : memref<98xf32, #tpu.memory_space<smem>>
    %c61 = arith.constant 61 : index
    %61 = memref.load %arg2[%c61] : memref<98xf32, #tpu.memory_space<smem>>
    %c62 = arith.constant 62 : index
    %62 = memref.load %arg2[%c62] : memref<98xf32, #tpu.memory_space<smem>>
    %c63 = arith.constant 63 : index
    %63 = memref.load %arg2[%c63] : memref<98xf32, #tpu.memory_space<smem>>
    %c64 = arith.constant 64 : index
    %64 = memref.load %arg2[%c64] : memref<98xf32, #tpu.memory_space<smem>>
    %c65 = arith.constant 65 : index
    %65 = memref.load %arg2[%c65] : memref<98xf32, #tpu.memory_space<smem>>
    %c66 = arith.constant 66 : index
    %66 = memref.load %arg2[%c66] : memref<98xf32, #tpu.memory_space<smem>>
    %c67 = arith.constant 67 : index
    %67 = memref.load %arg2[%c67] : memref<98xf32, #tpu.memory_space<smem>>
    %c68 = arith.constant 68 : index
    %68 = memref.load %arg2[%c68] : memref<98xf32, #tpu.memory_space<smem>>
    %c69 = arith.constant 69 : index
    %69 = memref.load %arg2[%c69] : memref<98xf32, #tpu.memory_space<smem>>
    %c70 = arith.constant 70 : index
    %70 = memref.load %arg2[%c70] : memref<98xf32, #tpu.memory_space<smem>>
    %c71 = arith.constant 71 : index
    %71 = memref.load %arg2[%c71] : memref<98xf32, #tpu.memory_space<smem>>
    %c72 = arith.constant 72 : index
    %72 = memref.load %arg2[%c72] : memref<98xf32, #tpu.memory_space<smem>>
    %c73 = arith.constant 73 : index
    %73 = memref.load %arg2[%c73] : memref<98xf32, #tpu.memory_space<smem>>
    %c74 = arith.constant 74 : index
    %74 = memref.load %arg2[%c74] : memref<98xf32, #tpu.memory_space<smem>>
    %c75 = arith.constant 75 : index
    %75 = memref.load %arg2[%c75] : memref<98xf32, #tpu.memory_space<smem>>
    %c76 = arith.constant 76 : index
    %76 = memref.load %arg2[%c76] : memref<98xf32, #tpu.memory_space<smem>>
    %c77 = arith.constant 77 : index
    %77 = memref.load %arg2[%c77] : memref<98xf32, #tpu.memory_space<smem>>
    %c78 = arith.constant 78 : index
    %78 = memref.load %arg2[%c78] : memref<98xf32, #tpu.memory_space<smem>>
    %c79 = arith.constant 79 : index
    %79 = memref.load %arg2[%c79] : memref<98xf32, #tpu.memory_space<smem>>
    %c80 = arith.constant 80 : index
    %80 = memref.load %arg2[%c80] : memref<98xf32, #tpu.memory_space<smem>>
    %c81 = arith.constant 81 : index
    %81 = memref.load %arg2[%c81] : memref<98xf32, #tpu.memory_space<smem>>
    %c82 = arith.constant 82 : index
    %82 = memref.load %arg2[%c82] : memref<98xf32, #tpu.memory_space<smem>>
    %c83 = arith.constant 83 : index
    %83 = memref.load %arg2[%c83] : memref<98xf32, #tpu.memory_space<smem>>
    %c84 = arith.constant 84 : index
    %84 = memref.load %arg2[%c84] : memref<98xf32, #tpu.memory_space<smem>>
    %c85 = arith.constant 85 : index
    %85 = memref.load %arg2[%c85] : memref<98xf32, #tpu.memory_space<smem>>
    %c86 = arith.constant 86 : index
    %86 = memref.load %arg2[%c86] : memref<98xf32, #tpu.memory_space<smem>>
    %c87 = arith.constant 87 : index
    %87 = memref.load %arg2[%c87] : memref<98xf32, #tpu.memory_space<smem>>
    %c88 = arith.constant 88 : index
    %88 = memref.load %arg2[%c88] : memref<98xf32, #tpu.memory_space<smem>>
    %c89 = arith.constant 89 : index
    %89 = memref.load %arg2[%c89] : memref<98xf32, #tpu.memory_space<smem>>
    %c90 = arith.constant 90 : index
    %90 = memref.load %arg2[%c90] : memref<98xf32, #tpu.memory_space<smem>>
    %c91 = arith.constant 91 : index
    %91 = memref.load %arg2[%c91] : memref<98xf32, #tpu.memory_space<smem>>
    %c92 = arith.constant 92 : index
    %92 = memref.load %arg2[%c92] : memref<98xf32, #tpu.memory_space<smem>>
    %c93 = arith.constant 93 : index
    %93 = memref.load %arg2[%c93] : memref<98xf32, #tpu.memory_space<smem>>
    %c94 = arith.constant 94 : index
    %94 = memref.load %arg2[%c94] : memref<98xf32, #tpu.memory_space<smem>>
    %c95 = arith.constant 95 : index
    %95 = memref.load %arg2[%c95] : memref<98xf32, #tpu.memory_space<smem>>
    %c96 = arith.constant 96 : index
    %96 = memref.load %arg2[%c96] : memref<98xf32, #tpu.memory_space<smem>>
    %c97 = arith.constant 97 : index
    %97 = memref.load %arg2[%c97] : memref<98xf32, #tpu.memory_space<smem>>
    %c0_0 = arith.constant 0 : index
    %98 = memref.load %arg3[%c0_0] : memref<1xf32, #tpu.memory_space<smem>>
    %cst = arith.constant 0.000000e+00 : f32
    %99 = vector.broadcast %cst : f32 to vector<2x24x44xf32>
    %c0_1 = arith.constant 0 : index
    %c0_2 = arith.constant 0 : index
    %c0_3 = arith.constant 0 : index
    %100 = vector.load %arg5[%c0_1, %c0_2, %c0_3] : memref<2x24x44xf32, #tpu.memory_space<vmem>>, vector<2x24x44xf32>
    tpu.vector_store %arg5[%c0_1, %c0_2, %c0_3], %99 {strides = array<i32>} : memref<2x24x44xf32, #tpu.memory_space<vmem>>, vector<2x24x44xf32>,
    %c0_4 = arith.constant 0 : index
    %c0_5 = arith.constant 0 : index
    %c0_6 = arith.constant 0 : index
    %c0_7 = arith.constant 0 : index
    %101 = vector.load %arg1[%c0_4, %c0_5, %c0_6, %c0_7] : memref<2x4x16x16xf32, #tpu.memory_space<vmem>>, vector<1x1x16x16xf32>
    %102 = vector.shape_cast %101 : vector<1x1x16x16xf32> to vector<16x16xf32>
    %c0_8 = arith.constant 0 : index
    %c1_9 = arith.constant 1 : index
    %c0_10 = arith.constant 0 : index
    %c0_11 = arith.constant 0 : index
    %103 = vector.load %arg1[%c0_8, %c1_9, %c0_10, %c0_11] : memref<2x4x16x16xf32, #tpu.memory_space<vmem>>, vector<1x1x16x16xf32>
    %104 = vector.shape_cast %103 : vector<1x1x16x16xf32> to vector<16x16xf32>
    %105 = arith.addf %102, %104 : vector<16x16xf32>
    %106 = arith.maximumf %102, %104 : vector<16x16xf32>
    %c0_12 = arith.constant 0 : index
    %c2_13 = arith.constant 2 : index
    %c0_14 = arith.constant 0 : index
    %c0_15 = arith.constant 0 : index
    %107 = vector.load %arg1[%c0_12, %c2_13, %c0_14, %c0_15] : memref<2x4x16x16xf32, #tpu.memory_space<vmem>>, vector<1x1x16x16xf32>
    %108 = vector.shape_cast %107 : vector<1x1x16x16xf32> to vector<16x16xf32>
    %109 = arith.addf %105, %108 : vector<16x16xf32>
    %110 = arith.maximumf %106, %108 : vector<16x16xf32>
    %c0_16 = arith.constant 0 : index
    %c3_17 = arith.constant 3 : index
    %c0_18 = arith.constant 0 : index
    %c0_19 = arith.constant 0 : index
    %111 = vector.load %arg1[%c0_16, %c3_17, %c0_18, %c0_19] : memref<2x4x16x16xf32, #tpu.memory_space<vmem>>, vector<1x1x16x16xf32>
    %112 = vector.shape_cast %111 : vector<1x1x16x16xf32> to vector<16x16xf32>
    %113 = arith.addf %109, %112 : vector<16x16xf32>
    %114 = arith.maximumf %110, %112 : vector<16x16xf32>
    %cst_20 = arith.constant 2.500000e-01 : f32
    %115 = vector.broadcast %cst_20 : f32 to vector<16x16xf32>
    %116 = arith.mulf %113, %115 : vector<16x16xf32>
    %cst_21 = arith.constant 0.000000e+00 : f32
    %117 = vector.broadcast %cst_21 : f32 to vector<16x16xf32>
    %118 = arith.maximumf %116, %117 : vector<16x16xf32>
    %c0_22 = arith.constant 0 : index
    %c3_23 = arith.constant 3 : index
    %c3_24 = arith.constant 3 : index
    %119 = vector.load %arg5[%c0_22, %c3_23, %c3_24] : memref<2x24x44xf32, #tpu.memory_space<vmem>>, vector<1x16x16xf32>
    %120 = vector.shape_cast %119 : vector<1x16x16xf32> to vector<16x16xf32>
    %121 = vector.shape_cast %118 : vector<16x16xf32> to vector<1x16x16xf32>
    tpu.vector_store %arg5[%c0_22, %c3_23, %c3_24], %121 {strides = array<i32>} : memref<2x24x44xf32, #tpu.memory_space<vmem>>, vector<1x16x16xf32>,
    %cst_25 = arith.constant 0.000000e+00 : f32
    %122 = vector.broadcast %cst_25 : f32 to vector<16x16xf32>
    %123 = arith.maximumf %114, %122 : vector<16x16xf32>
    %c1_26 = arith.constant 1 : index
    %c3_27 = arith.constant 3 : index
    %c3_28 = arith.constant 3 : index
    %124 = vector.load %arg5[%c1_26, %c3_27, %c3_28] : memref<2x24x44xf32, #tpu.memory_space<vmem>>, vector<1x16x16xf32>
    %125 = vector.shape_cast %124 : vector<1x16x16xf32> to vector<16x16xf32>
    %126 = vector.shape_cast %123 : vector<16x16xf32> to vector<1x16x16xf32>
    tpu.vector_store %arg5[%c1_26, %c3_27, %c3_28], %126 {strides = array<i32>} : memref<2x24x44xf32, #tpu.memory_space<vmem>>, vector<1x16x16xf32>,
    %c1_29 = arith.constant 1 : index
    %c0_30 = arith.constant 0 : index
    %c0_31 = arith.constant 0 : index
    %c0_32 = arith.constant 0 : index
    %127 = vector.load %arg1[%c1_29, %c0_30, %c0_31, %c0_32] : memref<2x4x16x16xf32, #tpu.memory_space<vmem>>, vector<1x1x16x16xf32>
    %128 = vector.shape_cast %127 : vector<1x1x16x16xf32> to vector<16x16xf32>
    %c1_33 = arith.constant 1 : index
    %c1_34 = arith.constant 1 : index
    %c0_35 = arith.constant 0 : index
    %c0_36 = arith.constant 0 : index
    %129 = vector.load %arg1[%c1_33, %c1_34, %c0_35, %c0_36] : memref<2x4x16x16xf32, #tpu.memory_space<vmem>>, vector<1x1x16x16xf32>
    %130 = vector.shape_cast %129 : vector<1x1x16x16xf32> to vector<16x16xf32>
    %131 = arith.addf %128, %130 : vector<16x16xf32>
    %132 = arith.maximumf %128, %130 : vector<16x16xf32>
    %c1_37 = arith.constant 1 : index
    %c2_38 = arith.constant 2 : index
    %c0_39 = arith.constant 0 : index
    %c0_40 = arith.constant 0 : index
    %133 = vector.load %arg1[%c1_37, %c2_38, %c0_39, %c0_40] : memref<2x4x16x16xf32, #tpu.memory_space<vmem>>, vector<1x1x16x16xf32>
    %134 = vector.shape_cast %133 : vector<1x1x16x16xf32> to vector<16x16xf32>
    %135 = arith.addf %131, %134 : vector<16x16xf32>
    %136 = arith.maximumf %132, %134 : vector<16x16xf32>
    %c1_41 = arith.constant 1 : index
    %c3_42 = arith.constant 3 : index
    %c0_43 = arith.constant 0 : index
    %c0_44 = arith.constant 0 : index
    %137 = vector.load %arg1[%c1_41, %c3_42, %c0_43, %c0_44] : memref<2x4x16x16xf32, #tpu.memory_space<vmem>>, vector<1x1x16x16xf32>
    %138 = vector.shape_cast %137 : vector<1x1x16x16xf32> to vector<16x16xf32>
    %139 = arith.addf %135, %138 : vector<16x16xf32>
    %140 = arith.maximumf %136, %138 : vector<16x16xf32>
    %cst_45 = arith.constant 2.500000e-01 : f32
    %141 = vector.broadcast %cst_45 : f32 to vector<16x16xf32>
    %142 = arith.mulf %139, %141 : vector<16x16xf32>
    %cst_46 = arith.constant 0.000000e+00 : f32
    %143 = vector.broadcast %cst_46 : f32 to vector<16x16xf32>
    %144 = arith.maximumf %142, %143 : vector<16x16xf32>
    %c0_47 = arith.constant 0 : index
    %c3_48 = arith.constant 3 : index
    %c25_49 = arith.constant 25 : index
    %145 = vector.load %arg5[%c0_47, %c3_48, %c25_49] : memref<2x24x44xf32, #tpu.memory_space<vmem>>, vector<1x16x16xf32>
    %146 = vector.shape_cast %145 : vector<1x16x16xf32> to vector<16x16xf32>
    %147 = vector.shape_cast %144 : vector<16x16xf32> to vector<1x16x16xf32>
    tpu.vector_store %arg5[%c0_47, %c3_48, %c25_49], %147 {strides = array<i32>} : memref<2x24x44xf32, #tpu.memory_space<vmem>>, vector<1x16x16xf32>,
    %cst_50 = arith.constant 0.000000e+00 : f32
    %148 = vector.broadcast %cst_50 : f32 to vector<16x16xf32>
    %149 = arith.maximumf %140, %148 : vector<16x16xf32>
    %c1_51 = arith.constant 1 : index
    %c3_52 = arith.constant 3 : index
    %c25_53 = arith.constant 25 : index
    %150 = vector.load %arg5[%c1_51, %c3_52, %c25_53] : memref<2x24x44xf32, #tpu.memory_space<vmem>>, vector<1x16x16xf32>
    %151 = vector.shape_cast %150 : vector<1x16x16xf32> to vector<16x16xf32>
    %152 = vector.shape_cast %149 : vector<16x16xf32> to vector<1x16x16xf32>
    tpu.vector_store %arg5[%c1_51, %c3_52, %c25_53], %152 {strides = array<i32>} : memref<2x24x44xf32, #tpu.memory_space<vmem>>, vector<1x16x16xf32>,
    %cst_54 = arith.constant 0.000000e+00 : f32
    %153 = vector.broadcast %cst_54 : f32 to vector<16x44xf32>
    %cst_55 = arith.constant 0.000000e+00 : f32
    %154 = vector.broadcast %cst_55 : f32 to vector<16x44xf32>
    %cst_56 = arith.constant 0.000000e+00 : f32
    %155 = vector.broadcast %cst_56 : f32 to vector<16x44xf32>
    %cst_57 = arith.constant 0.000000e+00 : f32
    %156 = vector.broadcast %cst_57 : f32 to vector<16x44xf32>
    %cst_58 = arith.constant 0.000000e+00 : f32
    %157 = vector.broadcast %cst_58 : f32 to vector<16x44xf32>
    %cst_59 = arith.constant 0.000000e+00 : f32
    %158 = vector.broadcast %cst_59 : f32 to vector<16x44xf32>
    %cst_60 = arith.constant 0.000000e+00 : f32
    %159 = vector.broadcast %cst_60 : f32 to vector<16x44xf32>
    %c0_61 = arith.constant 0 : index
    %c0_62 = arith.constant 0 : index
    %c0_63 = arith.constant 0 : index
    %160 = vector.load %arg5[%c0_61, %c0_62, %c0_63] : memref<2x24x44xf32, #tpu.memory_space<vmem>>, vector<1x16x44xf32>
    %161 = vector.shape_cast %160 : vector<1x16x44xf32> to vector<16x44xf32>
    %162 = vector.broadcast %0 : f32 to vector<16x44xf32>
    %163 = arith.mulf %162, %161 : vector<16x44xf32>
    %164 = arith.addf %153, %163 : vector<16x44xf32>
    %165 = vector.broadcast %1 : f32 to vector<16x44xf32>
    %166 = arith.mulf %165, %161 : vector<16x44xf32>
    %167 = arith.addf %154, %166 : vector<16x44xf32>
    %168 = vector.broadcast %2 : f32 to vector<16x44xf32>
    %169 = arith.mulf %168, %161 : vector<16x44xf32>
    %170 = arith.addf %155, %169 : vector<16x44xf32>
    %171 = vector.broadcast %3 : f32 to vector<16x44xf32>
    %172 = arith.mulf %171, %161 : vector<16x44xf32>
    %173 = arith.addf %156, %172 : vector<16x44xf32>
    %174 = vector.broadcast %4 : f32 to vector<16x44xf32>
    %175 = arith.mulf %174, %161 : vector<16x44xf32>
    %176 = arith.addf %157, %175 : vector<16x44xf32>
    %177 = vector.broadcast %5 : f32 to vector<16x44xf32>
    %178 = arith.mulf %177, %161 : vector<16x44xf32>
    %179 = arith.addf %158, %178 : vector<16x44xf32>
    %180 = vector.broadcast %6 : f32 to vector<16x44xf32>
    %181 = arith.mulf %180, %161 : vector<16x44xf32>
    %182 = arith.addf %159, %181 : vector<16x44xf32>
    %c0_64 = arith.constant 0 : index
    %c1_65 = arith.constant 1 : index
    %c0_66 = arith.constant 0 : index
    %183 = vector.load %arg5[%c0_64, %c1_65, %c0_66] : memref<2x24x44xf32, #tpu.memory_space<vmem>>, vector<1x16x44xf32>
    %184 = vector.shape_cast %183 : vector<1x16x44xf32> to vector<16x44xf32>
    %185 = vector.broadcast %7 : f32 to vector<16x44xf32>
    %186 = arith.mulf %185, %184 : vector<16x44xf32>
    %187 = arith.addf %164, %186 : vector<16x44xf32>
    %188 = vector.broadcast %8 : f32 to vector<16x44xf32>
    %189 = arith.mulf %188, %184 : vector<16x44xf32>
    %190 = arith.addf %167, %189 : vector<16x44xf32>
    %191 = vector.broadcast %9 : f32 to vector<16x44xf32>
    %192 = arith.mulf %191, %184 : vector<16x44xf32>
    %193 = arith.addf %170, %192 : vector<16x44xf32>
    %194 = vector.broadcast %10 : f32 to vector<16x44xf32>
    %195 = arith.mulf %194, %184 : vector<16x44xf32>
    %196 = arith.addf %173, %195 : vector<16x44xf32>
    %197 = vector.broadcast %11 : f32 to vector<16x44xf32>
    %198 = arith.mulf %197, %184 : vector<16x44xf32>
    %199 = arith.addf %176, %198 : vector<16x44xf32>
    %200 = vector.broadcast %12 : f32 to vector<16x44xf32>
    %201 = arith.mulf %200, %184 : vector<16x44xf32>
    %202 = arith.addf %179, %201 : vector<16x44xf32>
    %203 = vector.broadcast %13 : f32 to vector<16x44xf32>
    %204 = arith.mulf %203, %184 : vector<16x44xf32>
    %205 = arith.addf %182, %204 : vector<16x44xf32>
    %c0_67 = arith.constant 0 : index
    %c2_68 = arith.constant 2 : index
    %c0_69 = arith.constant 0 : index
    %206 = vector.load %arg5[%c0_67, %c2_68, %c0_69] : memref<2x24x44xf32, #tpu.memory_space<vmem>>, vector<1x16x44xf32>
    %207 = vector.shape_cast %206 : vector<1x16x44xf32> to vector<16x44xf32>
    %208 = vector.broadcast %14 : f32 to vector<16x44xf32>
    %209 = arith.mulf %208, %207 : vector<16x44xf32>
    %210 = arith.addf %187, %209 : vector<16x44xf32>
    %211 = vector.broadcast %15 : f32 to vector<16x44xf32>
    %212 = arith.mulf %211, %207 : vector<16x44xf32>
    %213 = arith.addf %190, %212 : vector<16x44xf32>
    %214 = vector.broadcast %16 : f32 to vector<16x44xf32>
    %215 = arith.mulf %214, %207 : vector<16x44xf32>
    %216 = arith.addf %193, %215 : vector<16x44xf32>
    %217 = vector.broadcast %17 : f32 to vector<16x44xf32>
    %218 = arith.mulf %217, %207 : vector<16x44xf32>
    %219 = arith.addf %196, %218 : vector<16x44xf32>
    %220 = vector.broadcast %18 : f32 to vector<16x44xf32>
    %221 = arith.mulf %220, %207 : vector<16x44xf32>
    %222 = arith.addf %199, %221 : vector<16x44xf32>
    %223 = vector.broadcast %19 : f32 to vector<16x44xf32>
    %224 = arith.mulf %223, %207 : vector<16x44xf32>
    %225 = arith.addf %202, %224 : vector<16x44xf32>
    %226 = vector.broadcast %20 : f32 to vector<16x44xf32>
    %227 = arith.mulf %226, %207 : vector<16x44xf32>
    %228 = arith.addf %205, %227 : vector<16x44xf32>
    %c0_70 = arith.constant 0 : index
    %c3_71 = arith.constant 3 : index
    %c0_72 = arith.constant 0 : index
    %229 = vector.load %arg5[%c0_70, %c3_71, %c0_72] : memref<2x24x44xf32, #tpu.memory_space<vmem>>, vector<1x16x44xf32>
    %230 = vector.shape_cast %229 : vector<1x16x44xf32> to vector<16x44xf32>
    %231 = vector.broadcast %21 : f32 to vector<16x44xf32>
    %232 = arith.mulf %231, %230 : vector<16x44xf32>
    %233 = arith.addf %210, %232 : vector<16x44xf32>
    %234 = vector.broadcast %22 : f32 to vector<16x44xf32>
    %235 = arith.mulf %234, %230 : vector<16x44xf32>
    %236 = arith.addf %213, %235 : vector<16x44xf32>
    %237 = vector.broadcast %23 : f32 to vector<16x44xf32>
    %238 = arith.mulf %237, %230 : vector<16x44xf32>
    %239 = arith.addf %216, %238 : vector<16x44xf32>
    %240 = vector.broadcast %24 : f32 to vector<16x44xf32>
    %241 = arith.mulf %240, %230 : vector<16x44xf32>
    %242 = arith.addf %219, %241 : vector<16x44xf32>
    %243 = vector.broadcast %25 : f32 to vector<16x44xf32>
    %244 = arith.mulf %243, %230 : vector<16x44xf32>
    %245 = arith.addf %222, %244 : vector<16x44xf32>
    %246 = vector.broadcast %26 : f32 to vector<16x44xf32>
    %247 = arith.mulf %246, %230 : vector<16x44xf32>
    %248 = arith.addf %225, %247 : vector<16x44xf32>
    %249 = vector.broadcast %27 : f32 to vector<16x44xf32>
    %250 = arith.mulf %249, %230 : vector<16x44xf32>
    %251 = arith.addf %228, %250 : vector<16x44xf32>
    %c0_73 = arith.constant 0 : index
    %c4_74 = arith.constant 4 : index
    %c0_75 = arith.constant 0 : index
    %252 = vector.load %arg5[%c0_73, %c4_74, %c0_75] : memref<2x24x44xf32, #tpu.memory_space<vmem>>, vector<1x16x44xf32>
    %253 = vector.shape_cast %252 : vector<1x16x44xf32> to vector<16x44xf32>
    %254 = vector.broadcast %28 : f32 to vector<16x44xf32>
    %255 = arith.mulf %254, %253 : vector<16x44xf32>
    %256 = arith.addf %233, %255 : vector<16x44xf32>
    %257 = vector.broadcast %29 : f32 to vector<16x44xf32>
    %258 = arith.mulf %257, %253 : vector<16x44xf32>
    %259 = arith.addf %236, %258 : vector<16x44xf32>
    %260 = vector.broadcast %30 : f32 to vector<16x44xf32>
    %261 = arith.mulf %260, %253 : vector<16x44xf32>
    %262 = arith.addf %239, %261 : vector<16x44xf32>
    %263 = vector.broadcast %31 : f32 to vector<16x44xf32>
    %264 = arith.mulf %263, %253 : vector<16x44xf32>
    %265 = arith.addf %242, %264 : vector<16x44xf32>
    %266 = vector.broadcast %32 : f32 to vector<16x44xf32>
    %267 = arith.mulf %266, %253 : vector<16x44xf32>
    %268 = arith.addf %245, %267 : vector<16x44xf32>
    %269 = vector.broadcast %33 : f32 to vector<16x44xf32>
    %270 = arith.mulf %269, %253 : vector<16x44xf32>
    %271 = arith.addf %248, %270 : vector<16x44xf32>
    %272 = vector.broadcast %34 : f32 to vector<16x44xf32>
    %273 = arith.mulf %272, %253 : vector<16x44xf32>
    %274 = arith.addf %251, %273 : vector<16x44xf32>
    %c0_76 = arith.constant 0 : index
    %c5_77 = arith.constant 5 : index
    %c0_78 = arith.constant 0 : index
    %275 = vector.load %arg5[%c0_76, %c5_77, %c0_78] : memref<2x24x44xf32, #tpu.memory_space<vmem>>, vector<1x16x44xf32>
    %276 = vector.shape_cast %275 : vector<1x16x44xf32> to vector<16x44xf32>
    %277 = vector.broadcast %35 : f32 to vector<16x44xf32>
    %278 = arith.mulf %277, %276 : vector<16x44xf32>
    %279 = arith.addf %256, %278 : vector<16x44xf32>
    %280 = vector.broadcast %36 : f32 to vector<16x44xf32>
    %281 = arith.mulf %280, %276 : vector<16x44xf32>
    %282 = arith.addf %259, %281 : vector<16x44xf32>
    %283 = vector.broadcast %37 : f32 to vector<16x44xf32>
    %284 = arith.mulf %283, %276 : vector<16x44xf32>
    %285 = arith.addf %262, %284 : vector<16x44xf32>
    %286 = vector.broadcast %38 : f32 to vector<16x44xf32>
    %287 = arith.mulf %286, %276 : vector<16x44xf32>
    %288 = arith.addf %265, %287 : vector<16x44xf32>
    %289 = vector.broadcast %39 : f32 to vector<16x44xf32>
    %290 = arith.mulf %289, %276 : vector<16x44xf32>
    %291 = arith.addf %268, %290 : vector<16x44xf32>
    %292 = vector.broadcast %40 : f32 to vector<16x44xf32>
    %293 = arith.mulf %292, %276 : vector<16x44xf32>
    %294 = arith.addf %271, %293 : vector<16x44xf32>
    %295 = vector.broadcast %41 : f32 to vector<16x44xf32>
    %296 = arith.mulf %295, %276 : vector<16x44xf32>
    %297 = arith.addf %274, %296 : vector<16x44xf32>
    %c0_79 = arith.constant 0 : index
    %c6_80 = arith.constant 6 : index
    %c0_81 = arith.constant 0 : index
    %298 = vector.load %arg5[%c0_79, %c6_80, %c0_81] : memref<2x24x44xf32, #tpu.memory_space<vmem>>, vector<1x16x44xf32>
    %299 = vector.shape_cast %298 : vector<1x16x44xf32> to vector<16x44xf32>
    %300 = vector.broadcast %42 : f32 to vector<16x44xf32>
    %301 = arith.mulf %300, %299 : vector<16x44xf32>
    %302 = arith.addf %279, %301 : vector<16x44xf32>
    %303 = vector.broadcast %43 : f32 to vector<16x44xf32>
    %304 = arith.mulf %303, %299 : vector<16x44xf32>
    %305 = arith.addf %282, %304 : vector<16x44xf32>
    %306 = vector.broadcast %44 : f32 to vector<16x44xf32>
    %307 = arith.mulf %306, %299 : vector<16x44xf32>
    %308 = arith.addf %285, %307 : vector<16x44xf32>
    %309 = vector.broadcast %45 : f32 to vector<16x44xf32>
    %310 = arith.mulf %309, %299 : vector<16x44xf32>
    %311 = arith.addf %288, %310 : vector<16x44xf32>
    %312 = vector.broadcast %46 : f32 to vector<16x44xf32>
    %313 = arith.mulf %312, %299 : vector<16x44xf32>
    %314 = arith.addf %291, %313 : vector<16x44xf32>
    %315 = vector.broadcast %47 : f32 to vector<16x44xf32>
    %316 = arith.mulf %315, %299 : vector<16x44xf32>
    %317 = arith.addf %294, %316 : vector<16x44xf32>
    %318 = vector.broadcast %48 : f32 to vector<16x44xf32>
    %319 = arith.mulf %318, %299 : vector<16x44xf32>
    %320 = arith.addf %297, %319 : vector<16x44xf32>
    %c1_82 = arith.constant 1 : index
    %c0_83 = arith.constant 0 : index
    %c0_84 = arith.constant 0 : index
    %321 = vector.load %arg5[%c1_82, %c0_83, %c0_84] : memref<2x24x44xf32, #tpu.memory_space<vmem>>, vector<1x16x44xf32>
    %322 = vector.shape_cast %321 : vector<1x16x44xf32> to vector<16x44xf32>
    %323 = vector.broadcast %49 : f32 to vector<16x44xf32>
    %324 = arith.mulf %323, %322 : vector<16x44xf32>
    %325 = arith.addf %302, %324 : vector<16x44xf32>
    %326 = vector.broadcast %50 : f32 to vector<16x44xf32>
    %327 = arith.mulf %326, %322 : vector<16x44xf32>
    %328 = arith.addf %305, %327 : vector<16x44xf32>
    %329 = vector.broadcast %51 : f32 to vector<16x44xf32>
    %330 = arith.mulf %329, %322 : vector<16x44xf32>
    %331 = arith.addf %308, %330 : vector<16x44xf32>
    %332 = vector.broadcast %52 : f32 to vector<16x44xf32>
    %333 = arith.mulf %332, %322 : vector<16x44xf32>
    %334 = arith.addf %311, %333 : vector<16x44xf32>
    %335 = vector.broadcast %53 : f32 to vector<16x44xf32>
    %336 = arith.mulf %335, %322 : vector<16x44xf32>
    %337 = arith.addf %314, %336 : vector<16x44xf32>
    %338 = vector.broadcast %54 : f32 to vector<16x44xf32>
    %339 = arith.mulf %338, %322 : vector<16x44xf32>
    %340 = arith.addf %317, %339 : vector<16x44xf32>
    %341 = vector.broadcast %55 : f32 to vector<16x44xf32>
    %342 = arith.mulf %341, %322 : vector<16x44xf32>
    %343 = arith.addf %320, %342 : vector<16x44xf32>
    %c1_85 = arith.constant 1 : index
    %c1_86 = arith.constant 1 : index
    %c0_87 = arith.constant 0 : index
    %344 = vector.load %arg5[%c1_85, %c1_86, %c0_87] : memref<2x24x44xf32, #tpu.memory_space<vmem>>, vector<1x16x44xf32>
    %345 = vector.shape_cast %344 : vector<1x16x44xf32> to vector<16x44xf32>
    %346 = vector.broadcast %56 : f32 to vector<16x44xf32>
    %347 = arith.mulf %346, %345 : vector<16x44xf32>
    %348 = arith.addf %325, %347 : vector<16x44xf32>
    %349 = vector.broadcast %57 : f32 to vector<16x44xf32>
    %350 = arith.mulf %349, %345 : vector<16x44xf32>
    %351 = arith.addf %328, %350 : vector<16x44xf32>
    %352 = vector.broadcast %58 : f32 to vector<16x44xf32>
    %353 = arith.mulf %352, %345 : vector<16x44xf32>
    %354 = arith.addf %331, %353 : vector<16x44xf32>
    %355 = vector.broadcast %59 : f32 to vector<16x44xf32>
    %356 = arith.mulf %355, %345 : vector<16x44xf32>
    %357 = arith.addf %334, %356 : vector<16x44xf32>
    %358 = vector.broadcast %60 : f32 to vector<16x44xf32>
    %359 = arith.mulf %358, %345 : vector<16x44xf32>
    %360 = arith.addf %337, %359 : vector<16x44xf32>
    %361 = vector.broadcast %61 : f32 to vector<16x44xf32>
    %362 = arith.mulf %361, %345 : vector<16x44xf32>
    %363 = arith.addf %340, %362 : vector<16x44xf32>
    %364 = vector.broadcast %62 : f32 to vector<16x44xf32>
    %365 = arith.mulf %364, %345 : vector<16x44xf32>
    %366 = arith.addf %343, %365 : vector<16x44xf32>
    %c1_88 = arith.constant 1 : index
    %c2_89 = arith.constant 2 : index
    %c0_90 = arith.constant 0 : index
    %367 = vector.load %arg5[%c1_88, %c2_89, %c0_90] : memref<2x24x44xf32, #tpu.memory_space<vmem>>, vector<1x16x44xf32>
    %368 = vector.shape_cast %367 : vector<1x16x44xf32> to vector<16x44xf32>
    %369 = vector.broadcast %63 : f32 to vector<16x44xf32>
    %370 = arith.mulf %369, %368 : vector<16x44xf32>
    %371 = arith.addf %348, %370 : vector<16x44xf32>
    %372 = vector.broadcast %64 : f32 to vector<16x44xf32>
    %373 = arith.mulf %372, %368 : vector<16x44xf32>
    %374 = arith.addf %351, %373 : vector<16x44xf32>
    %375 = vector.broadcast %65 : f32 to vector<16x44xf32>
    %376 = arith.mulf %375, %368 : vector<16x44xf32>
    %377 = arith.addf %354, %376 : vector<16x44xf32>
    %378 = vector.broadcast %66 : f32 to vector<16x44xf32>
    %379 = arith.mulf %378, %368 : vector<16x44xf32>
    %380 = arith.addf %357, %379 : vector<16x44xf32>
    %381 = vector.broadcast %67 : f32 to vector<16x44xf32>
    %382 = arith.mulf %381, %368 : vector<16x44xf32>
    %383 = arith.addf %360, %382 : vector<16x44xf32>
    %384 = vector.broadcast %68 : f32 to vector<16x44xf32>
    %385 = arith.mulf %384, %368 : vector<16x44xf32>
    %386 = arith.addf %363, %385 : vector<16x44xf32>
    %387 = vector.broadcast %69 : f32 to vector<16x44xf32>
    %388 = arith.mulf %387, %368 : vector<16x44xf32>
    %389 = arith.addf %366, %388 : vector<16x44xf32>
    %c1_91 = arith.constant 1 : index
    %c3_92 = arith.constant 3 : index
    %c0_93 = arith.constant 0 : index
    %390 = vector.load %arg5[%c1_91, %c3_92, %c0_93] : memref<2x24x44xf32, #tpu.memory_space<vmem>>, vector<1x16x44xf32>
    %391 = vector.shape_cast %390 : vector<1x16x44xf32> to vector<16x44xf32>
    %392 = vector.broadcast %70 : f32 to vector<16x44xf32>
    %393 = arith.mulf %392, %391 : vector<16x44xf32>
    %394 = arith.addf %371, %393 : vector<16x44xf32>
    %395 = vector.broadcast %71 : f32 to vector<16x44xf32>
    %396 = arith.mulf %395, %391 : vector<16x44xf32>
    %397 = arith.addf %374, %396 : vector<16x44xf32>
    %398 = vector.broadcast %72 : f32 to vector<16x44xf32>
    %399 = arith.mulf %398, %391 : vector<16x44xf32>
    %400 = arith.addf %377, %399 : vector<16x44xf32>
    %401 = vector.broadcast %73 : f32 to vector<16x44xf32>
    %402 = arith.mulf %401, %391 : vector<16x44xf32>
    %403 = arith.addf %380, %402 : vector<16x44xf32>
    %404 = vector.broadcast %74 : f32 to vector<16x44xf32>
    %405 = arith.mulf %404, %391 : vector<16x44xf32>
    %406 = arith.addf %383, %405 : vector<16x44xf32>
    %407 = vector.broadcast %75 : f32 to vector<16x44xf32>
    %408 = arith.mulf %407, %391 : vector<16x44xf32>
    %409 = arith.addf %386, %408 : vector<16x44xf32>
    %410 = vector.broadcast %76 : f32 to vector<16x44xf32>
    %411 = arith.mulf %410, %391 : vector<16x44xf32>
    %412 = arith.addf %389, %411 : vector<16x44xf32>
    %c1_94 = arith.constant 1 : index
    %c4_95 = arith.constant 4 : index
    %c0_96 = arith.constant 0 : index
    %413 = vector.load %arg5[%c1_94, %c4_95, %c0_96] : memref<2x24x44xf32, #tpu.memory_space<vmem>>, vector<1x16x44xf32>
    %414 = vector.shape_cast %413 : vector<1x16x44xf32> to vector<16x44xf32>
    %415 = vector.broadcast %77 : f32 to vector<16x44xf32>
    %416 = arith.mulf %415, %414 : vector<16x44xf32>
    %417 = arith.addf %394, %416 : vector<16x44xf32>
    %418 = vector.broadcast %78 : f32 to vector<16x44xf32>
    %419 = arith.mulf %418, %414 : vector<16x44xf32>
    %420 = arith.addf %397, %419 : vector<16x44xf32>
    %421 = vector.broadcast %79 : f32 to vector<16x44xf32>
    %422 = arith.mulf %421, %414 : vector<16x44xf32>
    %423 = arith.addf %400, %422 : vector<16x44xf32>
    %424 = vector.broadcast %80 : f32 to vector<16x44xf32>
    %425 = arith.mulf %424, %414 : vector<16x44xf32>
    %426 = arith.addf %403, %425 : vector<16x44xf32>
    %427 = vector.broadcast %81 : f32 to vector<16x44xf32>
    %428 = arith.mulf %427, %414 : vector<16x44xf32>
    %429 = arith.addf %406, %428 : vector<16x44xf32>
    %430 = vector.broadcast %82 : f32 to vector<16x44xf32>
    %431 = arith.mulf %430, %414 : vector<16x44xf32>
    %432 = arith.addf %409, %431 : vector<16x44xf32>
    %433 = vector.broadcast %83 : f32 to vector<16x44xf32>
    %434 = arith.mulf %433, %414 : vector<16x44xf32>
    %435 = arith.addf %412, %434 : vector<16x44xf32>
    %c1_97 = arith.constant 1 : index
    %c5_98 = arith.constant 5 : index
    %c0_99 = arith.constant 0 : index
    %436 = vector.load %arg5[%c1_97, %c5_98, %c0_99] : memref<2x24x44xf32, #tpu.memory_space<vmem>>, vector<1x16x44xf32>
    %437 = vector.shape_cast %436 : vector<1x16x44xf32> to vector<16x44xf32>
    %438 = vector.broadcast %84 : f32 to vector<16x44xf32>
    %439 = arith.mulf %438, %437 : vector<16x44xf32>
    %440 = arith.addf %417, %439 : vector<16x44xf32>
    %441 = vector.broadcast %85 : f32 to vector<16x44xf32>
    %442 = arith.mulf %441, %437 : vector<16x44xf32>
    %443 = arith.addf %420, %442 : vector<16x44xf32>
    %444 = vector.broadcast %86 : f32 to vector<16x44xf32>
    %445 = arith.mulf %444, %437 : vector<16x44xf32>
    %446 = arith.addf %423, %445 : vector<16x44xf32>
    %447 = vector.broadcast %87 : f32 to vector<16x44xf32>
    %448 = arith.mulf %447, %437 : vector<16x44xf32>
    %449 = arith.addf %426, %448 : vector<16x44xf32>
    %450 = vector.broadcast %88 : f32 to vector<16x44xf32>
    %451 = arith.mulf %450, %437 : vector<16x44xf32>
    %452 = arith.addf %429, %451 : vector<16x44xf32>
    %453 = vector.broadcast %89 : f32 to vector<16x44xf32>
    %454 = arith.mulf %453, %437 : vector<16x44xf32>
    %455 = arith.addf %432, %454 : vector<16x44xf32>
    %456 = vector.broadcast %90 : f32 to vector<16x44xf32>
    %457 = arith.mulf %456, %437 : vector<16x44xf32>
    %458 = arith.addf %435, %457 : vector<16x44xf32>
    %c1_100 = arith.constant 1 : index
    %c6_101 = arith.constant 6 : index
    %c0_102 = arith.constant 0 : index
    %459 = vector.load %arg5[%c1_100, %c6_101, %c0_102] : memref<2x24x44xf32, #tpu.memory_space<vmem>>, vector<1x16x44xf32>
    %460 = vector.shape_cast %459 : vector<1x16x44xf32> to vector<16x44xf32>
    %461 = vector.broadcast %91 : f32 to vector<16x44xf32>
    %462 = arith.mulf %461, %460 : vector<16x44xf32>
    %463 = arith.addf %440, %462 : vector<16x44xf32>
    %464 = vector.broadcast %92 : f32 to vector<16x44xf32>
    %465 = arith.mulf %464, %460 : vector<16x44xf32>
    %466 = arith.addf %443, %465 : vector<16x44xf32>
    %467 = vector.broadcast %93 : f32 to vector<16x44xf32>
    %468 = arith.mulf %467, %460 : vector<16x44xf32>
    %469 = arith.addf %446, %468 : vector<16x44xf32>
    %470 = vector.broadcast %94 : f32 to vector<16x44xf32>
    %471 = arith.mulf %470, %460 : vector<16x44xf32>
    %472 = arith.addf %449, %471 : vector<16x44xf32>
    %473 = vector.broadcast %95 : f32 to vector<16x44xf32>
    %474 = arith.mulf %473, %460 : vector<16x44xf32>
    %475 = arith.addf %452, %474 : vector<16x44xf32>
    %476 = vector.broadcast %96 : f32 to vector<16x44xf32>
    %477 = arith.mulf %476, %460 : vector<16x44xf32>
    %478 = arith.addf %455, %477 : vector<16x44xf32>
    %479 = vector.broadcast %97 : f32 to vector<16x44xf32>
    %480 = arith.mulf %479, %460 : vector<16x44xf32>
    %481 = arith.addf %458, %480 : vector<16x44xf32>
    %482 = vector.broadcast %98 : f32 to vector<16x38xf32>
    %483 = vector.extract_strided_slice %463 {offsets = [0, 0], sizes = [16, 38], strides = [1, 1]} : vector<16x44xf32> to vector<16x38xf32>
    %484 = arith.addf %482, %483 : vector<16x38xf32>
    %485 = vector.extract_strided_slice %466 {offsets = [0, 1], sizes = [16, 38], strides = [1, 1]} : vector<16x44xf32> to vector<16x38xf32>
    %486 = arith.addf %484, %485 : vector<16x38xf32>
    %487 = vector.extract_strided_slice %469 {offsets = [0, 2], sizes = [16, 38], strides = [1, 1]} : vector<16x44xf32> to vector<16x38xf32>
    %488 = arith.addf %486, %487 : vector<16x38xf32>
    %489 = vector.extract_strided_slice %472 {offsets = [0, 3], sizes = [16, 38], strides = [1, 1]} : vector<16x44xf32> to vector<16x38xf32>
    %490 = arith.addf %488, %489 : vector<16x38xf32>
    %491 = vector.extract_strided_slice %475 {offsets = [0, 4], sizes = [16, 38], strides = [1, 1]} : vector<16x44xf32> to vector<16x38xf32>
    %492 = arith.addf %490, %491 : vector<16x38xf32>
    %493 = vector.extract_strided_slice %478 {offsets = [0, 5], sizes = [16, 38], strides = [1, 1]} : vector<16x44xf32> to vector<16x38xf32>
    %494 = arith.addf %492, %493 : vector<16x38xf32>
    %495 = vector.extract_strided_slice %481 {offsets = [0, 6], sizes = [16, 38], strides = [1, 1]} : vector<16x44xf32> to vector<16x38xf32>
    %496 = arith.addf %494, %495 : vector<16x38xf32>
    %497 = vector.extract_strided_slice %496 {offsets = [0, 0], sizes = [16, 16], strides = [1, 1]} : vector<16x38xf32> to vector<16x16xf32>
    %c0_103 = arith.constant 0 : index
    %c0_104 = arith.constant 0 : index
    %c0_105 = arith.constant 0 : index
    %c0_106 = arith.constant 0 : index
    %498 = vector.load %arg4[%c0_103, %c0_104, %c0_105, %c0_106] : memref<2x1x16x16xf32, #tpu.memory_space<vmem>>, vector<1x1x16x16xf32>
    %499 = vector.shape_cast %498 : vector<1x1x16x16xf32> to vector<16x16xf32>
    %500 = vector.shape_cast %497 : vector<16x16xf32> to vector<1x1x16x16xf32>
    tpu.vector_store %arg4[%c0_103, %c0_104, %c0_105, %c0_106], %500 {strides = array<i32>} : memref<2x1x16x16xf32, #tpu.memory_space<vmem>>, vector<1x1x16x16xf32>,
    %501 = vector.extract_strided_slice %496 {offsets = [0, 22], sizes = [16, 16], strides = [1, 1]} : vector<16x38xf32> to vector<16x16xf32>
    %c1_107 = arith.constant 1 : index
    %c0_108 = arith.constant 0 : index
    %c0_109 = arith.constant 0 : index
    %c0_110 = arith.constant 0 : index
    %502 = vector.load %arg4[%c1_107, %c0_108, %c0_109, %c0_110] : memref<2x1x16x16xf32, #tpu.memory_space<vmem>>, vector<1x1x16x16xf32>
    %503 = vector.shape_cast %502 : vector<1x1x16x16xf32> to vector<16x16xf32>
    %504 = vector.shape_cast %501 : vector<16x16xf32> to vector<1x1x16x16xf32>
    tpu.vector_store %arg4[%c1_107, %c0_108, %c0_109, %c0_110], %504 {strides = array<i32>} : memref<2x1x16x16xf32, #tpu.memory_space<vmem>>, vector<1x1x16x16xf32>,
    return
  }
  func.func @transform_0(%arg0: i32) -> (i32, i32, i32, i32) {
    %c0_i32 = arith.constant 0 : i32
    %c0_i32_0 = arith.constant 0 : i32
    %c0_i32_1 = arith.constant 0 : i32
    %c0_i32_2 = arith.constant 0 : i32
    return %arg0, %c0_i32, %c0_i32_0, %c0_i32_1 : i32, i32, i32, i32
  }
  func.func @transform_1(%arg0: i32) -> i32 {
    %c0_i32 = arith.constant 0 : i32
    %c0_i32_0 = arith.constant 0 : i32
    return %c0_i32 : i32
  }
  func.func @transform_2(%arg0: i32) -> i32 {
    %c0_i32 = arith.constant 0 : i32
    %c0_i32_0 = arith.constant 0 : i32
    return %c0_i32 : i32
  }
  func.func @transform_3(%arg0: i32) -> (i32, i32, i32, i32) {
    %c0_i32 = arith.constant 0 : i32
    %c0_i32_0 = arith.constant 0 : i32
    %c0_i32_1 = arith.constant 0 : i32
    %c0_i32_2 = arith.constant 0 : i32
    return %arg0, %c0_i32, %c0_i32_0, %c0_i32_1 : i32, i32, i32, i32
  }
}

</mosaic_0001>

<bundles_post_ra>
// kernel: tpu_custom_call.1
= control target key start
LH: loop header
LB: loop body
LE: loop exit
PB: predicated region body
PF: predicated region fallthrough
CT: control target
= control target key end

     0   :  { %s1981_s0 = inlined_call_operand.hbm [shape: f32[2,4,16,16], index: 0, kind: input, shape index: {}]   ;;  %s1982_s1 = inlined_call_operand.vmem [shape: f32[98], index: 1, kind: input, shape index: {}]   ;;  %s1983_s2 = inlined_call_operand.<no memory space> [shape: f32[1], index: 2, kind: input, shape index: {}]   ;;  %s1984_s3 = inlined_call_operand.hbm [shape: f32[2,1,16,16], index: 3, kind: output, shape index: {}]  }
   0x1   :  { %2119 = sst [smem:[#allocation76_spill]] %s1983_s2 }
   0x2   :  { %2120 = sst [smem:[#allocation77_spill]] %s1984_s3 }
   0x3   :  { %9 = vsyncpa [#allocation5], 0 }
   0x4   :  { %10 = vsyncpa [#allocation7], 0 }
   0x5   :  { %11 = vsyncpa [#allocation6], 0  ;;  %s1038_s12 = smov [#allocation4]   ;;  %s30_s16 = sshll.u32 %s1982_s1, 4  ;;  %s31_s16 = int_to_ptr.vmem [resolvable:$true] %s30_s16 }
   0x6   :  { %s17_s13 = sshll.u32 %s1038_s12, 4  ;;  %s976_s19 = scalar_lea.hbm %s1981_s0, 2048  ;;  %s18_s13 = int_to_ptr.vmem [resolvable:$true] %s17_s13 }
   0x7   :  { %p977_p0 = scmp.ne.s32.totalorder %s1981_s0, %s976_s19  ;;  %p980_p1 = scmp.lt.u32.totalorder %s976_s19, %s1981_s0 }
   0x9   :  { %p982_p2 = pnand %p980_p1, %p977_p0 }
   0xb   :  { %985 = shalt.err (!%p982_p2)
}
   0xc   :  { %s986_s24 = scalar_lea.vmem %s18_s13, 2048  ;;  %p991_p4 = scmp.lt.s32.totalorder %s18_s13, %s18_s13 }
   0xd   :  { %p987_p3 = scmp.ne.s32.totalorder %s18_s13, %s986_s24  ;;  %p992_p5 = scmp.lt.s32.totalorder %s986_s24, %s986_s24 }
   0xf   :  { %p993_p6 = por %p992_p5, %p991_p4 }
  0x11   :  { %p994_p7 = pnand %p993_p6, %p987_p3 }
  0x13   :  { %997 = shalt.err (!%p994_p7)
}
  0x14   :  { %s1985_s1 = smov 128   ;;  %s1986_s25 = smov 8  }
  0x15   :  { %23 = dma.hbm_to_vmem [thread:$0]  %s1981_s0, 2048, %s18_s13, [#allocation5], %s1985_s1, %s1985_s1, %s1986_s25  }
  0x16   :  { %s998_s28 = scalar_lea.vmem %s31_s16, 16  ;;  %p1003_p9 = scmp.lt.s32.totalorder %s31_s16, %s31_s16 }
  0x17   :  { %p999_p8 = scmp.ne.s32.totalorder %s31_s16, %s998_s28  ;;  %p1004_p10 = scmp.lt.s32.totalorder %s998_s28, %s998_s28 }
  0x19   :  { %p1005_p11 = por %p1004_p10, %p1003_p9 }
  0x1b   :  { %p1006_p12 = pnand %p1005_p11, %p999_p8 }
  0x1d   :  { %1009 = shalt.err (!%p1006_p12)
}
  0x1e   :  { %s1041_s29 = smov [#allocation8]  }
  0x1f   :  { %33 = dma.vmem_to_smem %s31_s16, 16, %s1041_s29, [#allocation7]  }
  0x20   :  { %1032 = dma.done.wait [#allocation5], 2048  }
  0x21   :  { %1033 = vsyncadd [#allocation5], 4294965248 }
  0x22   :  { %1034 = dma.done.wait [#allocation7], 16  }
  0x23   :  { %1035 = vsyncadd [#allocation7], 4294967280 }
  0x24   :  { %42 = sfence }
  0x25   :  { %v149_v0 = vld [vmem:[#allocation4] sm:$0xff]  ;;  %v152_v1 = vld [vmem:[#allocation4 + $0x10] sm:$0xff]  ;;  %vm142_vm0 = vcmask 359424   ;;  %v150_v9 = vld [vmem:[#allocation4 + $0x8] sm:$0xff]  ;;  %v1042_v10 = vmov 0.0   ;;  %s1043_s0 = smov 3  }
  0x26   :  { %v159_v2 = vld [vmem:[#allocation4 + $0x20] sm:$0xff]  ;;  %v154_v3 = vadd.f32 %v152_v1, %v149_v0  ;;  %v204_v5 = vld [vmem:[#allocation4 + $0x50] sm:$0xff]  ;;  %143 = vst.msk [vmem:[#allocation2] sm:$0xff] %vm142_vm0, %v1042_v10  ;;  %144 = vst.msk [vmem:[#allocation2 + $0x8] sm:$0xff] %vm142_vm0, %v1042_v10  ;;  %v156_v15 = vmax.f32 %v149_v0, %v152_v1  ;;  %s1044_s30 = smov 25   ;;  %s1091_s4 = sld [smem:[#allocation8 + $0x1]] }
  0x27   :  { %v201_v4 = vld [vmem:[#allocation4 + $0x40] sm:$0xff]  ;;  %v166_v6 = vld [vmem:[#allocation4 + $0x30] sm:$0xff]  ;;  %145 = vst.msk [vmem:[#allocation2 + $0x10] sm:$0xff] %vm142_vm0, %v1042_v10  ;;  %146 = vst.msk [vmem:[#allocation2 + $0x18] sm:$0xff] %vm142_vm0, %v1042_v10  ;;  %s1093_s5 = sld [smem:[#allocation8 + $0x8]]  ;;  %s1095_s6 = sld [smem:[#allocation8 + $0xf]] }
  0x28   :  { %v206_v7 = vadd.f32 %v204_v5, %v201_v4  ;;  %v211_v8 = vld [vmem:[#allocation4 + $0x60] sm:$0xff]  ;;  %147 = vst.msk [vmem:[#allocation2 + $0x20] sm:$0xff] %vm142_vm0, %v1042_v10  ;;  %148 = vst.msk [vmem:[#allocation2 + $0x28] sm:$0xff] %vm142_vm0, %v1042_v10  ;;  %v161_v11 = vadd.f32 %v159_v2, %v154_v3  ;;  %v218_v12 = vld [vmem:[#allocation4 + $0x70] sm:$0xff]  ;;  %v163_v30 = vmax.f32 %v156_v15, %v159_v2  ;;  %s1097_s7 = sld [smem:[#allocation8 + $0x16]]  ;;  %s1099_s8 = sld [smem:[#allocation8 + $0x2]] }
  0x29   :  { %v153_v13 = vld [vmem:[#allocation4 + $0x18] sm:$0xff]  ;;  %v160_v14 = vld [vmem:[#allocation4 + $0x28] sm:$0xff]  ;;  %v208_v31 = vmax.f32 %v201_v4, %v204_v5  ;;  %s1101_s9 = sld [smem:[#allocation8 + $0x1d]]  ;;  %s1103_s10 = sld [smem:[#allocation8 + $0x24]]  ;;  %vm184_vm1 = vcmask 154648   ;;  %vm236_vm2 = vcmask 335048  }
  0x2a   :  { %v213_v16 = vadd.f32 %v211_v8, %v206_v7  ;;  %v155_v17 = vadd.f32 %v153_v13, %v150_v9  ;;  %v202_v18 = vld [vmem:[#allocation4 + $0x48] sm:$0xff]  ;;  %v205_v19 = vld [vmem:[#allocation4 + $0x58] sm:$0xff]  ;;  %v157_v21 = vmax.f32 %v150_v9, %v153_v13  ;;  %v168_v22 = vadd.f32 %v166_v6, %v161_v11  ;;  %s1105_s11 = sld [smem:[#allocation8 + $0x2b]]  ;;  %s1107_s12 = sld [smem:[#allocation8 + $0x9]] }
  0x2b   :  { %v212_v20 = vld [vmem:[#allocation4 + $0x68] sm:$0xff]  ;;  %v167_v23 = vld [vmem:[#allocation4 + $0x38] sm:$0xff]  ;;  %v207_v24 = vadd.f32 %v205_v19, %v202_v18  ;;  %v209_v35 = vmax.f32 %v202_v18, %v205_v19  ;;  %v170_v41 = vmax.f32 %v163_v30, %v166_v6  ;;  %v215_v42 = vmax.f32 %v208_v31, %v211_v8  ;;  %s1109_s13 = sld [smem:[#allocation8 + $0x10]]  ;;  %s1111_s14 = sld [smem:[#allocation8 + $0x17]] }
  0x2c   :  { %v220_v25 = vadd.f32 %v218_v12, %v213_v16  ;;  %v162_v26 = vadd.f32 %v160_v14, %v155_v17  ;;  %v219_v27 = vld [vmem:[#allocation4 + $0x78] sm:$0xff]  ;;  %v172_v28 = vmul.f32 0.25, %v168_v22  ;;  %v164_v34 = vmax.f32 %v157_v21, %v160_v14  ;;  %2121 = sst [smem:[#allocation13_spill]] %s1091_s4  ;;  %s1113_s15 = sld [smem:[#allocation8 + $0x1e]] }
  0x2d   :  { %v214_v29 = vadd.f32 %v212_v20, %v207_v24  ;;  %v216_v45 = vmax.f32 %v209_v35, %v212_v20  ;;  %v187_v47 = vmax.f32 %v170_v41, 0.0  ;;  %v222_v48 = vmax.f32 %v215_v42, %v218_v12  ;;  %2122 = sst [smem:[#allocation14_spill]] %s1093_s5  ;;  %s1115_s16 = sld [smem:[#allocation8 + $0x25]] }
  0x2e   :  { %v224_v32 = vmul.f32 0.25, %v220_v25  ;;  %v169_v33 = vadd.f32 %v167_v23, %v162_v26  ;;  %v174_v36 = vmax.f32 %v172_v28, 0.0  ;;  %v171_v44 = vmax.f32 %v164_v34, %v167_v23  ;;  %2123 = sst [smem:[#allocation15_spill]] %s1095_s6  ;;  %s1119_s18 = sld [smem:[#allocation8 + $0x2c]] }
  0x2f   :  { %v221_v37 = vadd.f32 %v219_v27, %v214_v29  ;;  %v223_v50 = vmax.f32 %v216_v45, %v219_v27  ;;  %v239_v51 = vmax.f32 %v222_v48, 0.0  ;;  %2124 = sst [smem:[#allocation16_spill]] %s1097_s7  ;;  %s1117_s17 = sld [smem:[#allocation8 + $0x32]]  ;;  %v258_v53 = vstv %s1091_s4 }
  0x30   :  { %v226_v38 = vmax.f32 %v224_v32, 0.0  ;;  %v173_v39 = vmul.f32 0.25, %v169_v33  ;;  %178 = vrot.lane.b32.xlu0 %v174_v36, %s1043_s0  ;;  %v188_v49 = vmax.f32 %v171_v44, 0.0  ;;  %2125 = sst [smem:[#allocation17_spill]] %s1099_s8  ;;  %s1121_s19 = sld [smem:[#allocation8 + $0x39]]  ;;  %v295_v54 = vstv %s1093_s5 }
  0x31   :  { %v225_v40 = vmul.f32 0.25, %v221_v37  ;;  %v240_v52 = vmax.f32 %v223_v50, 0.0  ;;  %2126 = sst [smem:[#allocation18_spill]] %s1101_s9  ;;  %s1123_s20 = sld [smem:[#allocation8 + $0x40]]  ;;  %v332_v55 = vstv %s1095_s6  ;;  %v369_v56 = vstv %s1097_s7 }
  0x32   :  { %230 = vrot.lane.b32.xlu1 %v226_v38, %s1044_s30  ;;  %v175_v43 = vmax.f32 %v173_v39, 0.0  ;;  %2127 = sst [smem:[#allocation19_spill]] %s1103_s10  ;;  %s1125_s21 = sld [smem:[#allocation8 + $0x47]]  ;;  %v406_v57 = vstv %s1101_s9  ;;  %v443_v58 = vstv %s1103_s10  ;;  %v480_v59 = vstv %s1105_s11 }
  0x33   :  { %v227_v46 = vmax.f32 %v225_v40, 0.0  ;;  %2128 = sst [smem:[#allocation20_spill]] %s1105_s11  ;;  %s1127_s22 = sld [smem:[#allocation8 + $0x4e]]  ;;  %v263_v60 = vstv %s1099_s8  ;;  %v300_v61 = vstv %s1107_s12  ;;  %v337_v62 = vstv %s1109_s13 }
  0x34   :  { %180 = vrot.lane.b32.xlu0 %v175_v43, %s1043_s0  ;;  %2129 = sst [smem:[#allocation21_spill]] %s1107_s12  ;;  %s1129_s23 = sld [smem:[#allocation8 + $0x55]]  ;;  %v374_v63 = vstv %s1111_s14  ;;  %v411_v0 = vstv %s1113_s15  ;;  %v448_v1 = vstv %s1115_s16  ;;  %vm832_vm3 = vcmask 130048  }
  0x35   :  { %2130 = sst [smem:[#allocation22_spill]] %s1109_s13  ;;  %s1131_s24 = sld [smem:[#allocation8 + $0x5c]]  ;;  %v517_v2 = vstv %s1117_s17  ;;  %v485_v4 = vstv %s1119_s18 }
  0x36   :  { %232 = vrot.lane.b32.xlu1 %v227_v46, %s1044_s30  ;;  %2131 = sst [smem:[#allocation23_spill]] %s1111_s14  ;;  %s1133_s26 = sld [smem:[#allocation8 + $0x33]]  ;;  %v554_v3 = vstv %s1121_s19 }
  0x37   :  { %2132 = sst [smem:[#allocation24_spill]] %s1113_s15  ;;  %s1137_s28 = sld [smem:[#allocation8 + $0x3a]]  ;;  %v591_v6 = vstv %s1123_s20 }
  0x38   :  { %191 = vrot.lane.b32.xlu0 %v187_v47, %s1043_s0  ;;  %2133 = sst [smem:[#allocation25_spill]] %s1115_s16  ;;  %s1135_s27 = sld [smem:[#allocation8 + $0x3]]  ;;  %v628_v7 = vstv %s1125_s21 }
  0x39   :  { %2134 = sst [smem:[#allocation26_spill]] %s1117_s17  ;;  %s1139_s29 = sld [smem:[#allocation8 + $0xa]] }
  0x3a   :  { %193 = vrot.lane.b32.xlu1 %v188_v49, %s1043_s0  ;;  %2135 = sst [smem:[#allocation27_spill]] %s1119_s18  ;;  %s1141_s0 = sld [smem:[#allocation8 + $0x11]] }
  0x3b   :  { %2136 = sst [smem:[#allocation28_spill]] %s1121_s19  ;;  %s1145_s1 = sld [smem:[#allocation8 + $0x41]] }
  0x3c   :  { %243 = vrot.lane.b32.xlu0 %v239_v51, %s1044_s30  ;;  %2137 = sst [smem:[#allocation29_spill]] %s1123_s20  ;;  %s1149_s3 = sld [smem:[#allocation8 + $0x4f]]  ;;  %v522_v5 = vstv %s1133_s26 }
  0x3d   :  { %2138 = sst [smem:[#allocation30_spill]] %s1125_s21  ;;  %s1147_s25 = sld [smem:[#allocation8 + $0x48]] }
  0x3e   :  { %245 = vrot.lane.b32.xlu1 %v240_v52, %s1044_s30  ;;  %2139 = sst [smem:[#allocation31_spill]] %s1127_s22  ;;  %s1143_s30 = sld [smem:[#allocation8 + $0x18]]  ;;  %v2115_v8 = vstv %s1135_s27 }
  0x3f   :  { %2140 = sst [smem:[#allocation32_spill]] %s1129_s23  ;;  %s1151_s2 = sld [smem:[#allocation8 + $0x56]]  ;;  %v2114_v9 = vstv %s1139_s29 }
  0x40   :  { %2141 = sst [smem:[#allocation33_spill]] %s1131_s24  ;;  %s1153_s24 = sld [smem:[#allocation8 + $0x5d]] }
  0x41   :  { %2142 = sst [smem:[#allocation34_spill]] %s1133_s26  ;;  %s1155_s23 = sld [smem:[#allocation8 + $0x1f]] }
  0x42   :  { %2143 = sst [smem:[#allocation35_spill]] %s1135_s27  ;;  %s1202_s4 = sld [smem:[#allocation8 + $0x3c]] }
  0x43   :  { %2144 = sst [smem:[#allocation36_spill]] %s1137_s28  ;;  %s1157_s22 = sld [smem:[#allocation8 + $0x26]]  ;;  %v633_v16 = vstv %s1147_s25 }
  0x44   :  { %2145 = sst [smem:[#allocation37_spill]] %s1139_s29  ;;  %s1159_s28 = sld [smem:[#allocation8 + $0x2d]] }
  0x45   :  { %2146 = sst [smem:[#allocation38_spill]] %s1141_s0  ;;  %s1161_s0 = sld [smem:[#allocation8 + $0x34]] }
  0x46   :  { %2147 = sst [smem:[#allocation39_spill]] %s1143_s30  ;;  %s1163_s30 = sld [smem:[#allocation8 + $0x4]] }
  0x47   :  { %2148 = sst [smem:[#allocation40_spill]] %s1145_s1  ;;  %s1204_s6 = sld [smem:[#allocation8 + $0xc]] }
  0x48   :  { %2149 = sst [smem:[#allocation41_spill]] %s1147_s25  ;;  %s1165_s1 = sld [smem:[#allocation8 + $0x3b]] }
  0x49   :  { %2150 = sst [smem:[#allocation42_spill]] %s1149_s3  ;;  %s1167_s3 = sld [smem:[#allocation8 + $0xb]] }
  0x4a   :  { %2151 = sst [smem:[#allocation43_spill]] %s1151_s2  ;;  %s1169_s2 = sld [smem:[#allocation8 + $0x12]] }
  0x4b   :  { %2152 = sst [smem:[#allocation44_spill]] %s1153_s24  ;;  %s1175_s24 = sld [smem:[#allocation8 + $0x49]] }
  0x4c   :  { %2153 = sst [smem:[#allocation45_spill]] %s1155_s23  ;;  %s1171_s23 = sld [smem:[#allocation8 + $0x19]] }
  0x4d   :  { %2154 = sst [smem:[#allocation46_spill]] %s1157_s22  ;;  %s1173_s22 = sld [smem:[#allocation8 + $0x42]] }
  0x4e   :  { %2155 = sst [smem:[#allocation47_spill]] %s1159_s28  ;;  %s2174_s7 = sld [smem:[#allocation32_spill]] }
  0x4f   :  { %2156 = sst [smem:[#allocation48_spill]] %s1161_s0  ;;  %s1177_s0 = sld [smem:[#allocation8 + $0x50]] }
  0x50   :  { %2157 = sst [smem:[#allocation49_spill]] %s1163_s30  ;;  %s1179_s30 = sld [smem:[#allocation8 + $0x57]] }
  0x51   :  { %2158 = sst [smem:[#allocation50_spill]] %s1165_s1  ;;  %s1181_s1 = sld [smem:[#allocation8 + $0x5e]] }
  0x52   :  { %2159 = sst [smem:[#allocation51_spill]] %s1167_s3  ;;  %s1183_s3 = sld [smem:[#allocation8 + $0x20]] }
  0x53   :  { %2160 = sst [smem:[#allocation52_spill]] %s1169_s2  ;;  %s2173_s9 = sld [smem:[#allocation31_spill]] }
  0x54   :  { %2161 = sst [smem:[#allocation53_spill]] %s1171_s23  ;;  %s1210_s5 = sld [smem:[#allocation8 + $0x13]]  ;;  %v702_v11 = vstv %s2174_s7 }
  0x55   :  { %2162 = sst [smem:[#allocation54_spill]] %s1173_s22  ;;  %s1186_s22 = sld [smem:[#allocation8 + $0x27]] }
  0x56   :  { %2163 = sst [smem:[#allocation55_spill]] %s1175_s24  ;;  %s1188_s24 = sld [smem:[#allocation8 + $0x2e]] }
  0x57   :  { %2164 = sst [smem:[#allocation56_spill]] %s1177_s0  ;;  %s2176_s10 = sld [smem:[#allocation33_spill]] }
  0x58   :  { %2165 = sst [smem:[#allocation57_spill]] %s1179_s30  ;;  %s1212_s11 = sld [smem:[#allocation8 + $0x1a]] }
  0x59   :  { %2166 = sst [smem:[#allocation58_spill]] %s1181_s1  ;;  %s2178_s8 = sld [smem:[#allocation36_spill]]  ;;  %v665_v10 = vstv %s2173_s9 }
  0x5a   :  { %2167 = sst [smem:[#allocation59_spill]] %s1183_s3  ;;  %s1194_s1 = sld [smem:[#allocation8 + $0x35]] }
  0x5b   :  { %2168 = sst [smem:[#allocation60_spill]] %s1186_s22  ;;  %s1196_s3 = sld [smem:[#allocation8 + $0x5]] }
  0x5c   :  { %2169 = sst [smem:[#allocation61_spill]] %s1188_s24  ;;  %s2179_s12 = sld [smem:[#allocation40_spill]] }
  0x5d   :  { %2171 = sst [smem:[#allocation63_spill]] %s1202_s4  ;;  %s1218_s4 = sld [smem:[#allocation8 + $0x43]]  ;;  %v739_v12 = vstv %s2176_s10 }
  0x5e   :  { %2172 = sst [smem:[#allocation64_spill]] %s1204_s6  ;;  %s1220_s13 = sld [smem:[#allocation8 + $0x4a]] }
  0x5f   :  { %2175 = sst [smem:[#allocation65_spill]] %s1210_s5  ;;  %s2182_s15 = sld [smem:[#allocation42_spill]]  ;;  %v2117_v13 = vstv %s2178_s8 }
  0x60   :  { %2170 = sst [smem:[#allocation62_spill]] %s1194_s1  ;;  %s2183_s16 = sld [smem:[#allocation43_spill]] }
  0x61   :  { %2177 = sst [smem:[#allocation66_spill]] %s1212_s11  ;;  %s1226_s14 = sld [smem:[#allocation8 + $0x51]] }
  0x62   :  { %s1228_s11 = sld [smem:[#allocation8 + $0x58]]  ;;  %s2185_s18 = sld [smem:[#allocation38_spill]]  ;;  %v2118_v15 = vstv %s2179_s12 }
  0x63   :  { %2180 = sst [smem:[#allocation67_spill]] %s1218_s4  ;;  %s2186_s26 = sld [smem:[#allocation39_spill]] }
  0x64   :  { %2181 = sst [smem:[#allocation68_spill]] %s1220_s13  ;;  %s1236_s13 = sld [smem:[#allocation8 + $0x21]] }
  0x65   :  { %s1234_s4 = sld [smem:[#allocation8 + $0x5f]]  ;;  %s2191_s20 = sld [smem:[#allocation49_spill]]  ;;  %v670_v17 = vstv %s2182_s15 }
  0x66   :  { %s2192_s29 = sld [smem:[#allocation51_spill]]  ;;  %v707_v18 = vstv %s2183_s16  ;;  %s1242_s9 = sld [smem:[#allocation8 + $0x28]] }
  0x67   :  { %s1244_s7 = sld [smem:[#allocation8 + $0x2f]]  ;;  %s1251_s25 = sld [smem:[#allocation8 + $0x36]] }
  0x68   :  { %v2111_v21 = vstv %s2185_s18  ;;  %s2197_s15 = sld [smem:[#allocation54_spill]]  ;;  %s1253_s12 = sld [smem:[#allocation8 + $0x6]] }
  0x69   :  { %v2112_v22 = vstv %s2186_s26  ;;  %s2199_s16 = sld [smem:[#allocation55_spill]]  ;;  %s1260_s27 = sld [smem:[#allocation8 + $0x3d]] }
  0x6a   :  { %2189 = sst [smem:[#allocation70_spill]] %s1236_s13  ;;  %s1262_s17 = sld [smem:[#allocation8 + $0xd]] }
  0x6b   :  { %2188 = sst [smem:[#allocation69_spill]] %s1234_s4  ;;  %v2113_v26 = vstv %s2191_s20  ;;  %s1268_s18 = sld [smem:[#allocation8 + $0x14]] }
  0x6c   :  { %v2116_v27 = vstv %s2192_s29  ;;  %s2206_s10 = sld [smem:[#allocation63_spill]]  ;;  %s1276_s28 = sld [smem:[#allocation8 + $0x44]] }
  0x6d   :  { %2193 = sst [smem:[#allocation49_spill]] %s1244_s7  ;;  %s2207_s8 = sld [smem:[#allocation67_spill]] }
  0x6e   :  { %2196 = sst [smem:[#allocation51_spill]] %s1251_s25  ;;  %s1278_s2 = sld [smem:[#allocation8 + $0x4b]] }
  0x6f   :  { %2198 = sst [smem:[#allocation54_spill]] %s1253_s12  ;;  %s1270_s12 = sld [smem:[#allocation8 + $0x1b]] }
  0x70   :  { %2200 = sst [smem:[#allocation55_spill]] %s1260_s27  ;;  %s2210_s21 = sld [smem:[#allocation66_spill]] }
  0x71   :  { %2201 = sst [smem:[#allocation71_spill]] %s1262_s17  ;;  %s1287_s30 = sld [smem:[#allocation8 + $0x59]] }
  0x72   :  { %2204 = sst [smem:[#allocation72_spill]] %s1268_s18  ;;  %s1285_s0 = sld [smem:[#allocation8 + $0x52]] }
  0x73   :  { %s1297_s26 = sld [smem:[#allocation8 + $0x60]]  ;;  %s1300_s24 = sld [smem:[#allocation8 + $0x22]] }
  0x74   :  { %2208 = sst [smem:[#allocation63_spill]] %s1278_s2  ;;  %s1306_s5 = sld [smem:[#allocation8 + $0x29]] }
  0x75   :  { %2205 = sst [smem:[#allocation73_spill]] %s1270_s12  ;;  %s1318_s13 = sld [smem:[#allocation8 + $0x30]] }
  0x76   :  { %s1338_s25 = sld [smem:[#allocation8 + $0x37]]  ;;  %s1340_s7 = sld [smem:[#allocation8 + $0x3e]] }
  0x77   :  { %2212 = sst [smem:[#allocation66_spill]] %s1287_s30  ;;  %s2233_s19 = sld [smem:[#allocation35_spill]] }
  0x78   :  { %2211 = sst [smem:[#allocation67_spill]] %s1285_s0  ;;  %s2235_s4 = sld [smem:[#allocation37_spill]] }
  0x79   :  { %2213 = sst [smem:[#allocation74_spill]] %s1297_s26  ;;  %s2244_s30 = sld [smem:[#allocation40_spill]] }
  0x7a   :  { %2214 = sst [smem:[#allocation75_spill]] %s1300_s24  ;;  %s2238_s24 = sld [smem:[#allocation39_spill]] }
  0x7b   :  { %2219 = sst [smem:[#allocation13_spill]] %s1306_s5  ;;  %s1560_s18 = sld [smem:[#allocation8 + $0x45]] }
  0x7c   :  { %2221 = sst [smem:[#allocation14_spill]] %s1318_s13  ;;  %s2251_s5 = sld [smem:[#allocation45_spill]] }
  0x7d   :  { %2224 = sst [smem:[#allocation17_spill]] %s1338_s25  ;;  %s2237_s13 = sld [smem:[#allocation38_spill]] }
  0x7e   :  { %2225 = sst [smem:[#allocation21_spill]] %s1340_s7  ;;  %s2242_s25 = sld [smem:[#allocation36_spill]] }
  0x7f   :  { %s2252_s7 = sld [smem:[#allocation44_spill]]  ;;  %s2253_s1 = sld [smem:[#allocation46_spill]] }
  0x80   :  { %s1045_s0 = smov 127   ;;  %s2255_s17 = sld [smem:[#allocation47_spill]] }
  0x81   :  { %s2256_s6 = sld [smem:[#allocation48_spill]]  ;;  %s2261_s12 = sld [smem:[#allocation50_spill]] }
  0x82   :  { %s2280_s23 = sld [smem:[#allocation60_spill]]  ;;  %s2285_s26 = sld [smem:[#allocation61_spill]] }
  0x83   :  { %s2286_s22 = sld [smem:[#allocation62_spill]]  ;;  %s2291_s27 = sld [smem:[#allocation58_spill]] }
  0x84   :  { %s1047_s2 = smov 125  }
  0xa2   :  { %v179_v14 = vpop.permute.xlu0 %178 }
  0xa3   :  { %185 = vst.msk [vmem:[#allocation2 + $0x3] sm:$0xff] %vm184_vm1, %v179_v14 }
  0xa4   :  { %v231_v19 = vpop.permute.xlu1 %230 }
  0xa5   :  { %237 = vst.msk [vmem:[#allocation2 + $0x3] sm:$0xff] %vm236_vm2, %v231_v19 }
  0xa6   :  { %v181_v32 = vpop.permute.xlu0 %180 }
  0xa7   :  { %186 = vst.msk [vmem:[#allocation2 + $0xb] sm:$0xff] %vm184_vm1, %v181_v32 }
  0xa8   :  { %v233_v37 = vpop.permute.xlu1 %232 }
  0xa9   :  { %238 = vst.msk [vmem:[#allocation2 + $0xb] sm:$0xff] %vm236_vm2, %v233_v37 }
  0xaa   :  { %v192_v50 = vpop.permute.xlu0 %191 }
  0xab   :  { %198 = vst.msk [vmem:[#allocation2 + $0x1b] sm:$0xff] %vm184_vm1, %v192_v50 }
  0xac   :  { %v1308_v32 = vld [vmem:[#allocation2] sm:$0xff]  ;;  %v194_v51 = vpop.permute.xlu1 %193 }
  0xad   :  { %v1310_v37 = vld [vmem:[#allocation2 + $0x1] sm:$0xff]  ;;  %199 = vst.msk [vmem:[#allocation2 + $0x23] sm:$0xff] %vm184_vm1, %v194_v51  ;;  %v259_v48 = vmul.f32 %v258_v53, %v1308_v32  ;;  %v264_v52 = vmul.f32 %v263_v60, %v1308_v32 }
  0xae   :  { %v1312_v49 = vld [vmem:[#allocation2 + $0x2] sm:$0xff]  ;;  %v296_v50 = vmul.f32 %v295_v54, %v1310_v37  ;;  %v301_v45 = vmul.f32 %v300_v61, %v1310_v37  ;;  %v244_v47 = vpop.permute.xlu0 %243 }
  0xaf   :  { %v1332_v14 = vld [vmem:[#allocation2 + $0x3] sm:$0xff]  ;;  %v333_v44 = vmul.f32 %v332_v55, %v1312_v49  ;;  %249 = vst.msk [vmem:[#allocation2 + $0x1b] sm:$0xff] %vm236_vm2, %v244_v47  ;;  %v1443_v28 = vmul.f32 %v2111_v21, %v1312_v49 }
  0xb0   :  { %v298_v46 = vadd.f32 %v296_v50, %v259_v48  ;;  %v1349_v19 = vld [vmem:[#allocation2 + $0x8] sm:$0xff]  ;;  %v246_v43 = vpop.permute.xlu1 %245  ;;  %v303_v48 = vadd.f32 %v301_v45, %v264_v52  ;;  %v338_v50 = vmul.f32 %v337_v62, %v1312_v49  ;;  %v370_v47 = vmul.f32 %v369_v56, %v1332_v14 }
  0xb1   :  { %v1351_v41 = vld [vmem:[#allocation2 + $0x9] sm:$0xff]  ;;  %250 = vst.msk [vmem:[#allocation2 + $0x23] sm:$0xff] %vm236_vm2, %v246_v43  ;;  %v260_v45 = vmul.f32 %v258_v53, %v1349_v19  ;;  %v375_v43 = vmul.f32 %v374_v63, %v1332_v14 }
  0xb2   :  { %v1353_v40 = vld [vmem:[#allocation2 + $0xa] sm:$0xff]  ;;  %v335_v36 = vadd.f32 %v333_v44, %v298_v46  ;;  %v297_v52 = vmul.f32 %v295_v54, %v1351_v41  ;;  %v340_v39 = vadd.f32 %v338_v50, %v303_v48 }
  0xb3   :  { %v1361_v42 = vld [vmem:[#allocation2 + $0x4] sm:$0xff]  ;;  %v334_v31 = vmul.f32 %v332_v55, %v1353_v40  ;;  %v1408_v30 = vld [vmem:[#allocation2 + $0xd] sm:$0xff] }
  0xb4   :  { %v1373_v51 = vld [vmem:[#allocation2 + $0xb] sm:$0xff]  ;;  %v372_v35 = vadd.f32 %v370_v47, %v335_v36  ;;  %v407_v53 = vmul.f32 %v406_v57, %v1361_v42  ;;  %v299_v54 = vadd.f32 %v297_v52, %v260_v45  ;;  %v377_v48 = vadd.f32 %v375_v43, %v340_v39 }
  0xb5   :  { %v1375_v38 = vld [vmem:[#allocation2 + $0x5] sm:$0xff]  ;;  %v412_v50 = vmul.f32 %v411_v0, %v1361_v42  ;;  %v371_v55 = vmul.f32 %v369_v56, %v1373_v51  ;;  %v1436_v33 = vld [vmem:[#allocation2 + $0xe] sm:$0xff] }
  0xb6   :  { %v1388_v34 = vld [vmem:[#allocation2 + $0x6] sm:$0xff]  ;;  %v409_v47 = vadd.f32 %v407_v53, %v372_v35  ;;  %v444_v45 = vmul.f32 %v443_v58, %v1375_v38  ;;  %v336_v52 = vadd.f32 %v334_v31, %v299_v54  ;;  %v449_v43 = vmul.f32 %v448_v1, %v1375_v38  ;;  %v1413_v31 = vld [vmem:[#allocation2 + $0x18] sm:$0xff] }
  0xb7   :  { %v1395_v36 = vld [vmem:[#allocation2 + $0xc] sm:$0xff]  ;;  %v414_v39 = vadd.f32 %v412_v50, %v377_v48  ;;  %v481_v53 = vmul.f32 %v480_v59, %v1388_v34  ;;  %v1415_v56 = vld [vmem:[#allocation2 + $0x19] sm:$0xff]  ;;  %v1420_v48 = vmul.f32 %v2115_v8, %v1308_v32  ;;  %v518_v50 = vmul.f32 %v517_v2, %v1413_v31 }
  0xb8   :  { %v446_v35 = vadd.f32 %v444_v45, %v409_v47  ;;  %v373_v54 = vadd.f32 %v371_v55, %v336_v52  ;;  %v1425_v47 = vld [vmem:[#allocation2 + $0x1a] sm:$0xff]  ;;  %v408_v45 = vmul.f32 %v406_v57, %v1395_v36  ;;  %v306_v52 = vmul.f32 %v2114_v9, %v1310_v37 }
  0xb9   :  { %v451_v44 = vadd.f32 %v449_v43, %v414_v39  ;;  %v555_v46 = vmul.f32 %v554_v3, %v1415_v56  ;;  %v1438_v29 = vld [vmem:[#allocation2 + $0x20] sm:$0xff]  ;;  %v1448_v57 = vmul.f32 %v2112_v22, %v1332_v14  ;;  %v445_v43 = vmul.f32 %v443_v58, %v1408_v30 }
  0xba   :  { %v483_v55 = vadd.f32 %v481_v53, %v446_v35  ;;  %v410_v39 = vadd.f32 %v408_v45, %v373_v54  ;;  %v486_v35 = vmul.f32 %v485_v4, %v1388_v34  ;;  %v1459_v53 = vmul.f32 %v2113_v26, %v1308_v32  ;;  %v1464_v25 = vld [vmem:[#allocation2 + $0x1b] sm:$0xff] }
  0xbb   :  { %v592_v22 = vmul.f32 %v591_v6, %v1425_v47  ;;  %v265_v58 = vmul.f32 %v263_v60, %v1349_v19  ;;  %v302_v54 = vmul.f32 %v300_v61, %v1351_v41  ;;  %v482_v26 = vmul.f32 %v480_v59, %v1436_v33  ;;  %v1478_v8 = vld [vmem:[#allocation2 + $0x1c] sm:$0xff] }
  0xbc   :  { %v520_v21 = vadd.f32 %v518_v50, %v483_v55  ;;  %v447_v45 = vadd.f32 %v445_v43, %v410_v39  ;;  %v519_v50 = vmul.f32 %v517_v2, %v1438_v29  ;;  %v488_v55 = vadd.f32 %v486_v35, %v451_v44  ;;  %v1480_v24 = vld [vmem:[#allocation2 + $0x21] sm:$0xff] }
  0xbd   :  { %v523_v60 = vmul.f32 %v522_v5, %v1413_v31  ;;  %v560_v61 = vmul.f32 %v2117_v13, %v1415_v56  ;;  %v1491_v59 = vmul.f32 %v2116_v27, %v1310_v37  ;;  %v629_v2 = vmul.f32 %v628_v7, %v1464_v25  ;;  %v1504_v35 = vld [vmem:[#allocation2 + $0x1e] sm:$0xff] }
  0xbe   :  { %v557_v9 = vadd.f32 %v555_v46, %v520_v21  ;;  %v1496_v21 = vld [vmem:[#allocation2 + $0x1d] sm:$0xff]  ;;  %v484_v44 = vadd.f32 %v482_v26, %v447_v45  ;;  %v339_v46 = vmul.f32 %v337_v62, %v1353_v40  ;;  %v376_v39 = vmul.f32 %v374_v63, %v1373_v51 }
  0xbf   :  { %v1506_v27 = vld [vmem:[#allocation2 + $0x22] sm:$0xff]  ;;  %v525_v20 = vadd.f32 %v523_v60, %v488_v55  ;;  %v597_v26 = vmul.f32 %v2118_v15, %v1425_v47  ;;  %v304_v45 = vadd.f32 %v302_v54, %v265_v58  ;;  %v666_v62 = vmul.f32 %v665_v10, %v1478_v8 }
  0xc0   :  { %v594_v43 = vadd.f32 %v592_v22, %v557_v9  ;;  %v1508_v13 = vld [vmem:[#allocation2 + $0x23] sm:$0xff]  ;;  %v521_v63 = vadd.f32 %v519_v50, %v484_v44  ;;  %v556_v9 = vmul.f32 %v554_v3, %v1480_v24  ;;  %v413_v22 = vmul.f32 %v411_v0, %v1395_v36 }
  0xc1   :  { %v703_v55 = vmul.f32 %v702_v11, %v1496_v21  ;;  %v1525_v60 = vld [vmem:[#allocation2 + $0x24] sm:$0xff]  ;;  %v562_v58 = vadd.f32 %v560_v61, %v525_v20  ;;  %v341_v54 = vadd.f32 %v339_v46, %v304_v45  ;;  %v740_v15 = vmul.f32 %v739_v12, %v1504_v35 }
  0xc2   :  { %v631_v23 = vadd.f32 %v629_v2, %v594_v43  ;;  %v558_v50 = vadd.f32 %v556_v9, %v521_v63  ;;  %v593_v3 = vmul.f32 %v591_v6, %v1506_v27  ;;  %v630_v0 = vmul.f32 %v628_v7, %v1508_v13  ;;  %v1546_v7 = vld [vmem:[#allocation2 + $0x25] sm:$0xff] }
  0xc3   :  { %v599_v44 = vadd.f32 %v597_v26, %v562_v58  ;;  %v634_v43 = vmul.f32 %v633_v16, %v1464_v25  ;;  %v378_v20 = vadd.f32 %v376_v39, %v341_v54  ;;  %v667_v46 = vmul.f32 %v665_v10, %v1525_v60  ;;  %v1551_v9 = vld [vmem:[#allocation2 + $0x26] sm:$0xff] }
  0xc4   :  { %v668_v2 = vadd.f32 %v666_v62, %v631_v23  ;;  %v595_v61 = vadd.f32 %v593_v3, %v558_v50  ;;  %v671_v45 = vmul.f32 %v670_v17, %v1478_v8  ;;  %v308_v6 = vadd.f32 %v306_v52, %v1420_v48 }
  0xc5   :  { %v636_v23 = vadd.f32 %v634_v43, %v599_v44  ;;  %v415_v26 = vadd.f32 %v413_v22, %v378_v20  ;;  %v450_v39 = vmul.f32 %v448_v1, %v1408_v30  ;;  %v708_v10 = vmul.f32 %v707_v18, %v1496_v21 }
  0xc6   :  { %v705_v63 = vadd.f32 %v703_v55, %v668_v2  ;;  %v632_v62 = vadd.f32 %v630_v0, %v595_v61  ;;  %v487_v48 = vmul.f32 %v485_v4, %v1436_v33  ;;  %v345_v52 = vadd.f32 %v1443_v28, %v308_v6 }
  0xc7   :  { %v673_v22 = vadd.f32 %v671_v45, %v636_v23  ;;  %v452_v1 = vadd.f32 %v450_v39, %v415_v26  ;;  %v524_v58 = vmul.f32 %v522_v5, %v1438_v29  ;;  %v704_v50 = vmul.f32 %v702_v11, %v1546_v7 }
  0xc8   :  { %v742_v55 = vadd.f32 %v740_v15, %v705_v63  ;;  %v669_v54 = vadd.f32 %v667_v46, %v632_v62  ;;  %v382_v4 = vadd.f32 %v1448_v57, %v345_v52  ;;  %v2254_v28 = vstv %s2251_s5 }
  0xc9   :  { %v417_v3 = vmul.f32 %v2254_v28, %v1361_v42  ;;  %v741_v15 = vmul.f32 %v739_v12, %v1551_v9  ;;  %v710_v0 = vadd.f32 %v708_v10, %v673_v22  ;;  %v2257_v5 = vstv %s2252_s7 }
  0xca   :  { %774 = vrot.lane.b32.xlu0 %v742_v55, %s1045_s0  ;;  %v745_v2 = vmul.f32 %v2257_v5, %v1504_v35  ;;  %v489_v44 = vadd.f32 %v487_v48, %v452_v1  ;;  %v706_v11 = vadd.f32 %v704_v50, %v669_v54  ;;  %v2258_v57 = vstv %s2253_s1 }
  0xcb   :  { %v419_v43 = vadd.f32 %v417_v3, %v382_v4  ;;  %v454_v20 = vmul.f32 %v2258_v57, %v1375_v38  ;;  %v2259_v61 = vstv %s2233_s19  ;;  %v2260_v12 = vstv %s2242_s25  ;;  %s1046_s19 = smov 126   ;;  %s2267_s25 = sld [smem:[#allocation52_spill]] }
  0xcc   :  { %v270_v46 = vmul.f32 %v2259_v61, %v1349_v19  ;;  %v747_v45 = vadd.f32 %v745_v2, %v710_v0  ;;  %v526_v6 = vadd.f32 %v524_v58, %v489_v44  ;;  %v561_v63 = vmul.f32 %v2260_v12, %v1480_v24 }
  0xcd   :  { %v2262_v23 = vstv %s2235_s4  ;;  %v743_v39 = vadd.f32 %v741_v15, %v706_v11  ;;  %v456_v62 = vadd.f32 %v454_v20, %v419_v43  ;;  %v2263_v10 = vstv %s2255_s17  ;;  %s2272_s4 = sld [smem:[#allocation56_spill]] }
  0xce   :  { %v307_v26 = vmul.f32 %v2262_v23, %v1351_v41  ;;  %v491_v48 = vmul.f32 %v2263_v10, %v1388_v34  ;;  %v2264_v52 = vstv %s2256_s6  ;;  %784 = vrot.lane.b32.xlu0 %v747_v45, %s1046_s19  ;;  %v563_v22 = vadd.f32 %v561_v63, %v526_v6 }
  0xcf   :  { %v528_v55 = vmul.f32 %v2264_v52, %v1413_v31  ;;  %v2265_v1 = vstv %s2244_s30  ;;  %v2266_v50 = vstv %s2237_s13  ;;  %776 = vrot.lane.b32.xlu1 %v743_v39, %s1045_s0  ;;  %v635_v28 = vmul.f32 %v633_v16, %v1508_v13  ;;  %s2270_s13 = sld [smem:[#allocation53_spill]]  ;;  %s2278_s30 = sld [smem:[#allocation57_spill]] }
  0xd0   :  { %v598_v58 = vmul.f32 %v2265_v1, %v1506_v27  ;;  %v309_v54 = vadd.f32 %v307_v26, %v270_v46  ;;  %v344_v4 = vmul.f32 %v2266_v50, %v1353_v40  ;;  %v493_v3 = vadd.f32 %v491_v48, %v456_v62  ;;  %s2336_s0 = sld [smem:[#allocation71_spill]] }
  0xd1   :  { %v2268_v15 = vstv %s2261_s12  ;;  %v616_v5 = vstv %s1560_s18  ;;  %v672_v44 = vmul.f32 %v670_v17, %v1525_v60  ;;  %v2269_v43 = vstv %s2238_s24  ;;  %s2276_s24 = sld [smem:[#allocation59_spill]]  ;;  %s870_s18 = sld [smem:[#allocation8 + $0x7]] }
  0xd2   :  { %v565_v0 = vmul.f32 %v2268_v15, %v1415_v56  ;;  %v600_v2 = vadd.f32 %v598_v58, %v563_v22  ;;  %v346_v11 = vadd.f32 %v344_v4, %v309_v54  ;;  %v381_v57 = vmul.f32 %v2269_v43, %v1373_v51 }
  0xd3   :  { %v709_v16 = vmul.f32 %v707_v18, %v1546_v7  ;;  %v530_v20 = vadd.f32 %v528_v55, %v493_v3  ;;  %v2271_v61 = vstv %s2197_s15  ;;  %v313_v45 = vadd.f32 %v1491_v59, %v1459_v53 }
  0xd4   :  { %v602_v46 = vmul.f32 %v2271_v61, %v1425_v47  ;;  %v637_v6 = vadd.f32 %v635_v28, %v600_v2  ;;  %v383_v17 = vadd.f32 %v381_v57, %v346_v11  ;;  %v2273_v12 = vstv %s2251_s5  ;;  %s2316_s5 = sld [smem:[#allocation70_spill]] }
  0xd5   :  { %v418_v63 = vmul.f32 %v2273_v12, %v1395_v36  ;;  %v2274_v23 = vstv %s2267_s25  ;;  %v2275_v18 = vstv %s2252_s7  ;;  %v567_v62 = vadd.f32 %v565_v0, %v530_v20  ;;  %s2324_s7 = sld [smem:[#allocation49_spill]] }
  0xd6   :  { %v348_v26 = vmul.f32 %v2274_v23, %v1312_v49  ;;  %v746_v39 = vmul.f32 %v2275_v18, %v1551_v9  ;;  %v2277_v10 = vstv %s2199_s16  ;;  %v2279_v53 = vstv %s2253_s1  ;;  %s2327_s1 = sld [smem:[#allocation51_spill]] }
  0xd7   :  { %v639_v48 = vmul.f32 %v2277_v10, %v1464_v25  ;;  %v455_v59 = vmul.f32 %v2279_v53, %v1408_v30  ;;  %v674_v52 = vadd.f32 %v672_v44, %v637_v6  ;;  %v420_v55 = vadd.f32 %v418_v63, %v383_v17 }
  0xd8   :  { %v350_v22 = vadd.f32 %v348_v26, %v313_v45  ;;  %v2281_v1 = vstv %s2270_s13  ;;  %v604_v54 = vadd.f32 %v602_v46, %v567_v62  ;;  %v2282_v50 = vstv %s2272_s4 }
  0xd9   :  { %v385_v58 = vmul.f32 %v2281_v1, %v1332_v14  ;;  %v676_v4 = vmul.f32 %v2282_v50, %v1478_v8  ;;  %v2283_v28 = vstv %s2255_s17  ;;  %v2284_v15 = vstv %s2256_s6  ;;  %s2347_s17 = sld [smem:[#allocation73_spill]]  ;;  %s2349_s6 = sld [smem:[#allocation67_spill]] }
  0xda   :  { %v492_v3 = vmul.f32 %v2283_v28, %v1436_v33  ;;  %v529_v0 = vmul.f32 %v2284_v15, %v1438_v29  ;;  %v711_v2 = vadd.f32 %v709_v16, %v674_v52  ;;  %v457_v44 = vadd.f32 %v455_v59, %v420_v55 }
  0xdb   :  { %v387_v11 = vadd.f32 %v385_v58, %v350_v22  ;;  %v2287_v43 = vstv %s2276_s24  ;;  %v641_v20 = vadd.f32 %v639_v48, %v604_v54  ;;  %v2288_v61 = vstv %s2278_s30 }
  0xdc   :  { %v422_v57 = vmul.f32 %v2287_v43, %v1361_v42  ;;  %v713_v46 = vmul.f32 %v2288_v61, %v1496_v21  ;;  %v2289_v45 = vstv %s2280_s23  ;;  %v2290_v17 = vstv %s2191_s20  ;;  %s2300_s20 = sld [smem:[#allocation64_spill]] }
  0xdd   :  { %v459_v6 = vmul.f32 %v2289_v45, %v1375_v38  ;;  %v275_v12 = vmul.f32 %v2290_v17, %v1349_v19  ;;  %v748_v63 = vadd.f32 %v746_v39, %v711_v2  ;;  %v494_v16 = vadd.f32 %v492_v3, %v457_v44 }
  0xde   :  { %v424_v23 = vadd.f32 %v422_v57, %v387_v11  ;;  %v2292_v26 = vstv %s2192_s29  ;;  %v678_v62 = vadd.f32 %v676_v4, %v641_v20  ;;  %v2293_v10 = vstv %s2261_s12  ;;  %s2306_s29 = sld [smem:[#allocation65_spill]]  ;;  %s2351_s12 = sld [smem:[#allocation66_spill]] }
  0xdf   :  { %v312_v18 = vmul.f32 %v2292_v26, %v1351_v41  ;;  %v566_v48 = vmul.f32 %v2293_v10, %v1480_v24  ;;  %v2294_v53 = vstv %s2285_s26  ;;  %v2295_v52 = vstv %s2286_s22  ;;  %786 = vrot.lane.b32.xlu1 %v748_v63, %s1046_s19  ;;  %s2362_s19 = sld [smem:[#allocation13_spill]] }
  0xe0   :  { %v496_v59 = vmul.f32 %v2294_v53, %v1388_v34  ;;  %v533_v55 = vmul.f32 %v2295_v52, %v1413_v31  ;;  %v531_v39 = vadd.f32 %v529_v0, %v494_v16  ;;  %v461_v22 = vadd.f32 %v459_v6, %v424_v23 }
  0xe1   :  { %v314_v1 = vadd.f32 %v312_v18, %v275_v12  ;;  %v2296_v58 = vstv %s2267_s25  ;;  %v715_v50 = vadd.f32 %v713_v46, %v678_v62  ;;  %v2297_v4 = vstv %s2291_s27  ;;  %s1829_s25 = sld [smem:[#allocation8 + $0x4c]]  ;;  %s43_s27 = sld [smem:[#allocation8]] }
  0xe2   :  { %v349_v54 = vmul.f32 %v2296_v58, %v1353_v40  ;;  %v750_v28 = vmul.f32 %v2297_v4, %v1504_v35  ;;  %v2298_v3 = vstv %s2197_s15  ;;  %v2299_v2 = vstv %s2206_s10  ;;  %s2305_s15 = sld [smem:[#allocation68_spill]] }
  0xe3   :  { %v603_v15 = vmul.f32 %v2298_v3, %v1506_v27  ;;  %v570_v44 = vmul.f32 %v2299_v2, %v1415_v56  ;;  %v568_v11 = vadd.f32 %v566_v48, %v531_v39  ;;  %v498_v0 = vadd.f32 %v496_v59, %v461_v22 }
  0xe4   :  { %v351_v43 = vadd.f32 %v349_v54, %v314_v1  ;;  %v2301_v57 = vstv %s2270_s13  ;;  %v752_v61 = vadd.f32 %v750_v28, %v715_v50  ;;  %v2302_v46 = vstv %s2199_s16  ;;  %s2313_s16 = sld [smem:[#allocation69_spill]]  ;;  %s2365_s13 = sld [smem:[#allocation14_spill]] }
  0xe5   :  { %v386_v20 = vmul.f32 %v2301_v57, %v1373_v51  ;;  %v640_v45 = vmul.f32 %v2302_v46, %v1508_v13  ;;  %v2303_v6 = vstv %s2272_s4  ;;  %v2304_v12 = vstv %s2207_s8  ;;  %s2367_s4 = sld [smem:[#allocation17_spill]] }
  0xe6   :  { %v677_v17 = vmul.f32 %v2303_v6, %v1525_v60  ;;  %v607_v63 = vmul.f32 %v2304_v12, %v1425_v47  ;;  %v605_v16 = vadd.f32 %v603_v15, %v568_v11  ;;  %v535_v23 = vadd.f32 %v533_v55, %v498_v0  ;;  %794 = vrot.lane.b32.xlu0 %v752_v61, %s1047_s2 }
  0xe7   :  { %v388_v26 = vadd.f32 %v386_v20, %v351_v43  ;;  %v2307_v18 = vstv %s2276_s24  ;;  %v2308_v10 = vstv %s2278_s30  ;;  %v2309_v53 = vmov %v2297_v4  ;;  %s1847_s24 = sld [smem:[#allocation8 + $0x53]]  ;;  %s2372_s30 = sld [smem:[#allocation21_spill]] }
  0xe8   :  { %v423_v62 = vmul.f32 %v2307_v18, %v1395_v36  ;;  %v714_v48 = vmul.f32 %v2308_v10, %v1546_v7  ;;  %v751_v59 = vmul.f32 %v2309_v53, %v1551_v9  ;;  %v2310_v52 = vstv %s1196_s3 }
  0xe9   :  { %v279_v55 = vmul.f32 %v2310_v52, %v1308_v32  ;;  %v2311_v39 = vstv %s2300_s20  ;;  %v642_v1 = vadd.f32 %v640_v45, %v605_v16  ;;  %v572_v58 = vadd.f32 %v570_v44, %v535_v23 }
  0xea   :  { %v316_v22 = vmul.f32 %v2311_v39, %v1310_v37  ;;  %v425_v54 = vadd.f32 %v423_v62, %v388_v26  ;;  %v2312_v50 = vstv %s2280_s23  ;;  %v2314_v28 = vstv %s2305_s15  ;;  %s1875_s23 = sld [smem:[#allocation8 + $0x61]] }
  0xeb   :  { %v460_v4 = vmul.f32 %v2312_v50, %v1408_v30  ;;  %v644_v3 = vmul.f32 %v2314_v28, %v1464_v25  ;;  %v2315_v15 = vstv %s2285_s26  ;;  %v2317_v0 = vstv %s2306_s29  ;;  %s1049_s26 = smov 123  }
  0xec   :  { %v497_v2 = vmul.f32 %v2315_v15, %v1436_v33  ;;  %v318_v11 = vadd.f32 %v316_v22, %v279_v55  ;;  %v353_v43 = vmul.f32 %v2317_v0, %v1312_v49  ;;  %v679_v57 = vadd.f32 %v677_v17, %v642_v1 }
  0xed   :  { %v609_v44 = vadd.f32 %v607_v63, %v572_v58  ;;  %v462_v20 = vadd.f32 %v460_v4, %v425_v54  ;;  %v2318_v61 = vstv %s2286_s22  ;;  %v2319_v45 = vstv %s1226_s14  ;;  %s1050_s22 = smov 122  }
  0xee   :  { %v534_v46 = vmul.f32 %v2318_v61, %v1438_v29  ;;  %v681_v6 = vmul.f32 %v2319_v45, %v1478_v8  ;;  %v2320_v12 = vstv %s1228_s11  ;;  %v355_v23 = vadd.f32 %v353_v43, %v318_v11 }
  0xef   :  { %v718_v16 = vmul.f32 %v2320_v12, %v1496_v21  ;;  %v2321_v26 = vstv %s2210_s21  ;;  %v716_v62 = vadd.f32 %v714_v48, %v679_v57  ;;  %v646_v17 = vadd.f32 %v644_v3, %v609_v44 }
  0xf0   :  { %v390_v18 = vmul.f32 %v2321_v26, %v1332_v14  ;;  %v2322_v63 = vstv %s2313_s16  ;;  %v499_v53 = vadd.f32 %v497_v2, %v462_v20  ;;  %v2323_v55 = vstv %s2316_s5 }
  0xf1   :  { %v755_v10 = vmul.f32 %v2322_v63, %v1504_v35  ;;  %v427_v39 = vmul.f32 %v2323_v55, %v1361_v42  ;;  %v2325_v22 = vstv %s1196_s3  ;;  %v2326_v58 = vstv %s2300_s20  ;;  %s2331_s3 = sld [smem:[#allocation55_spill]]  ;;  %s877_s20 = sld [smem:[#allocation8 + $0xe]] }
  0xf2   :  { %v392_v52 = vadd.f32 %v390_v18, %v355_v23  ;;  %v280_v1 = vmul.f32 %v2325_v22, %v1349_v19  ;;  %v317_v54 = vmul.f32 %v2326_v58, %v1351_v41  ;;  %v753_v50 = vadd.f32 %v751_v59, %v716_v62 }
  0xf3   :  { %v683_v48 = vadd.f32 %v681_v6, %v646_v17  ;;  %v536_v4 = vadd.f32 %v534_v46, %v499_v53  ;;  %v2328_v28 = vstv %s2206_s10  ;;  %v2329_v2 = vstv %s1242_s9  ;;  %s2335_s10 = sld [smem:[#allocation54_spill]] }
  0xf4   :  { %v571_v3 = vmul.f32 %v2328_v28, %v1480_v24  ;;  %v429_v15 = vadd.f32 %v427_v39, %v392_v52  ;;  %v464_v11 = vmul.f32 %v2329_v2, %v1375_v38  ;;  %v319_v0 = vadd.f32 %v317_v54, %v280_v1  ;;  %796 = vrot.lane.b32.xlu1 %v753_v50, %s1047_s2  ;;  %s1919_s2 = sld [smem:[#allocation8 + $0x23]] }
  0xf5   :  { %v2330_v43 = vstv %s2306_s29  ;;  %v720_v59 = vadd.f32 %v718_v16, %v683_v48  ;;  %v2332_v20 = vstv %s2207_s8  ;;  %v2333_v46 = vstv %s2324_s7  ;;  %s2341_s8 = sld [smem:[#allocation72_spill]]  ;;  %s891_s29 = sld [smem:[#allocation8 + $0x1c]] }
  0xf6   :  { %v354_v57 = vmul.f32 %v2330_v43, %v1353_v40  ;;  %v573_v44 = vadd.f32 %v571_v3, %v536_v4  ;;  %v608_v61 = vmul.f32 %v2332_v20, %v1506_v27  ;;  %v501_v45 = vmul.f32 %v2333_v46, %v1388_v34 }
  0xf7   :  { %v466_v6 = vadd.f32 %v464_v11, %v429_v15  ;;  %v2334_v12 = vstv %s2327_s1  ;;  %v2337_v18 = vstv %s2210_s21  ;;  %v757_v16 = vadd.f32 %v755_v10, %v720_v59  ;;  %s1048_s21 = smov 124  }
  0xf8   :  { %v538_v23 = vmul.f32 %v2334_v12, %v1413_v31  ;;  %v356_v26 = vadd.f32 %v354_v57, %v319_v0  ;;  %v391_v62 = vmul.f32 %v2337_v18, %v1373_v51  ;;  %v610_v17 = vadd.f32 %v608_v61, %v573_v44 }
  0xf9   :  { %v2338_v63 = vstv %s2305_s15  ;;  %v2339_v52 = vstv %s1226_s14  ;;  %v503_v39 = vadd.f32 %v501_v45, %v466_v6  ;;  %v2340_v22 = vstv %s2331_s3  ;;  %804 = vrot.lane.b32.xlu0 %v757_v16, %s1048_s21  ;;  %s2345_s14 = sld [smem:[#allocation63_spill]]  ;;  %s884_s15 = sld [smem:[#allocation8 + $0x15]] }
  0xfa   :  { %v645_v53 = vmul.f32 %v2338_v63, %v1508_v13  ;;  %v682_v55 = vmul.f32 %v2339_v52, %v1525_v60  ;;  %v575_v1 = vmul.f32 %v2340_v22, %v1415_v56  ;;  %v393_v58 = vadd.f32 %v391_v62, %v356_v26 }
  0xfb   :  { %v2342_v54 = vstv %s2316_s5  ;;  %v2343_v48 = vstv %s1228_s11  ;;  %v2344_v28 = vstv %s2335_s10  ;;  %v2346_v15 = vstv %s2336_s0  ;;  %s2354_s11 = sld [smem:[#allocation75_spill]]  ;;  %s912_s5 = sld [smem:[#allocation8 + $0x31]] }
  0xfc   :  { %v428_v50 = vmul.f32 %v2342_v54, %v1395_v36  ;;  %v647_v10 = vadd.f32 %v645_v53, %v610_v17  ;;  %v719_v4 = vmul.f32 %v2343_v48, %v1546_v7  ;;  %v284_v3 = vmul.f32 %v2344_v28, %v1308_v32 }
  0xfd   :  { %v321_v2 = vmul.f32 %v2346_v15, %v1310_v37  ;;  %v540_v11 = vadd.f32 %v538_v23, %v503_v39  ;;  %v2348_v0 = vstv %s1276_s28  ;;  %v2350_v59 = vstv %s1242_s9  ;;  %s2359_s9 = sld [smem:[#allocation74_spill]] }
  0xfe   :  { %v612_v43 = vmul.f32 %v2348_v0, %v1425_v47  ;;  %v430_v57 = vadd.f32 %v428_v50, %v393_v58  ;;  %v465_v44 = vmul.f32 %v2350_v59, %v1408_v30  ;;  %v684_v20 = vadd.f32 %v682_v55, %v647_v10 }
  0xff   :  { %v2352_v61 = vstv %s2313_s16  ;;  %v323_v45 = vadd.f32 %v321_v2, %v284_v3  ;;  %v2353_v6 = vstv %s2341_s8  ;;  %v577_v26 = vadd.f32 %v575_v1, %v540_v11  ;;  %s1924_s16 = sld [smem:[#allocation8 + $0x2a]] }
 0x100   :  { %v756_v46 = vmul.f32 %v2352_v61, %v1551_v9  ;;  %v358_v12 = vmul.f32 %v2353_v6, %v1312_v49  ;;  %v467_v23 = vadd.f32 %v465_v44, %v430_v57  ;;  %v2355_v18 = vstv %s2324_s7  ;;  %s1929_s7 = sld [smem:[#allocation8 + $0x38]] }
 0x101   :  { %v502_v62 = vmul.f32 %v2355_v18, %v1436_v33  ;;  %v2356_v16 = vstv %s2327_s1  ;;  %v721_v63 = vadd.f32 %v719_v4, %v684_v20  ;;  %v2357_v53 = vstv %s2345_s14  ;;  %s1934_s1 = sld [smem:[#allocation8 + $0x3f]] }
 0x102   :  { %v539_v17 = vmul.f32 %v2356_v16, %v1438_v29  ;;  %v649_v52 = vmul.f32 %v2357_v53, %v1464_v25  ;;  %v360_v55 = vadd.f32 %v358_v12, %v323_v45  ;;  %v2358_v39 = vstv %s2347_s17 }
 0x103   :  { %v395_v22 = vmul.f32 %v2358_v39, %v1332_v14  ;;  %v614_v1 = vadd.f32 %v612_v43, %v577_v26  ;;  %v2360_v58 = vstv %s2349_s6  ;;  %v2361_v50 = vstv %s2351_s12 }
 0x104   :  { %v686_v54 = vmul.f32 %v2360_v58, %v1478_v8  ;;  %v723_v10 = vmul.f32 %v2361_v50, %v1496_v21  ;;  %v504_v48 = vadd.f32 %v502_v62, %v467_v23  ;;  %v758_v4 = vadd.f32 %v756_v46, %v721_v63 }
 0x105   :  { %v2363_v28 = vstv %s2331_s3  ;;  %v397_v15 = vadd.f32 %v395_v22, %v360_v55  ;;  %v2364_v2 = vstv %s2354_s11  ;;  %v651_v0 = vadd.f32 %v649_v52, %v614_v1  ;;  %s933_s3 = sld [smem:[#allocation8 + $0x46]] }
 0x106   :  { %v576_v3 = vmul.f32 %v2363_v28, %v1480_v24  ;;  %v432_v11 = vmul.f32 %v2364_v2, %v1361_v42  ;;  %v541_v43 = vadd.f32 %v539_v17, %v504_v48  ;;  %v2366_v57 = vstv %s2335_s10  ;;  %806 = vrot.lane.b32.xlu1 %v758_v4, %s1048_s21  ;;  %s940_s10 = sld [smem:[#allocation8 + $0x4d]] }
 0x107   :  { %v285_v59 = vmul.f32 %v2366_v57, %v1349_v19  ;;  %v2368_v44 = vstv %s2336_s0  ;;  %v2369_v61 = vstv %s2359_s9  ;;  %v2370_v45 = vstv %s1276_s28  ;;  %s1864_s28 = sld [smem:[#allocation8 + $0x5a]]  ;;  %s1946_s0 = sld [smem:[#allocation8 + $0x54]] }
 0x108   :  { %v322_v20 = vmul.f32 %v2368_v44, %v1351_v41  ;;  %v760_v46 = vmul.f32 %v2369_v61, %v1504_v35  ;;  %v613_v6 = vmul.f32 %v2370_v45, %v1506_v27  ;;  %v434_v12 = vadd.f32 %v432_v11, %v397_v15 }
 0x109   :  { %v2371_v26 = vstv %s2362_s19  ;;  %v688_v18 = vadd.f32 %v686_v54, %v651_v0  ;;  %v578_v62 = vadd.f32 %v576_v3, %v541_v43  ;;  %v2373_v17 = vstv %s2341_s8  ;;  %s954_s8 = sld [smem:[#allocation8 + $0x5b]] }
 0x10a   :  { %v469_v23 = vmul.f32 %v2371_v26, %v1375_v38  ;;  %v324_v16 = vadd.f32 %v322_v20, %v285_v59  ;;  %v359_v63 = vmul.f32 %v2373_v17, %v1353_v40  ;;  %v650_v52 = vmul.f32 %v2357_v53, %v1508_v13 }
 0x10b   :  { %v2374_v39 = vstv %s2365_s13  ;;  %v2375_v1 = vstv %s2367_s4  ;;  %v725_v50 = vadd.f32 %v723_v10, %v688_v18  ;;  %v615_v54 = vadd.f32 %v613_v6, %v578_v62 }
 0x10c   :  { %v471_v55 = vadd.f32 %v469_v23, %v434_v12  ;;  %v506_v22 = vmul.f32 %v2374_v39, %v1388_v34  ;;  %v543_v58 = vmul.f32 %v2375_v1, %v1413_v31  ;;  %v361_v48 = vadd.f32 %v359_v63, %v324_v16 }
 0x10d   :  { %v2376_v4 = vstv %s2347_s17  ;;  %v2377_v3 = vstv %s2349_s6  ;;  %v2378_v11 = vstv %s2372_s30  ;;  %v762_v43 = vadd.f32 %v760_v46, %v725_v50  ;;  %s2385_s17 = sld [smem:[#allocation76_spill]]  ;;  %s1051_s6 = smov 106  }
 0x10e   :  { %v396_v28 = vmul.f32 %v2376_v4, %v1373_v51  ;;  %v687_v15 = vmul.f32 %v2377_v3, %v1525_v60  ;;  %v508_v2 = vadd.f32 %v506_v22, %v471_v55  ;;  %v580_v0 = vmul.f32 %v2378_v11, %v1415_v56 }
 0x10f   :  { %v652_v10 = vadd.f32 %v650_v52, %v615_v54  ;;  %v2379_v59 = vstv %s2354_s11  ;;  %v617_v61 = vmul.f32 %v616_v5, %v1425_v47  ;;  %v653_v45 = vstv %s1829_s25  ;;  %814 = vrot.lane.b32.xlu0 %v762_v43, %s1049_s26 }
 0x110   :  { %v398_v57 = vadd.f32 %v396_v28, %v361_v48  ;;  %v433_v44 = vmul.f32 %v2379_v59, %v1395_v36  ;;  %v545_v20 = vadd.f32 %v543_v58, %v508_v2  ;;  %v2380_v46 = vstv %s2351_s12  ;;  %s1052_s12 = smov [#allocation9]  }
 0x111   :  { %v689_v6 = vadd.f32 %v687_v15, %v652_v10  ;;  %v724_v12 = vmul.f32 %v2380_v46, %v1546_v7  ;;  %v2381_v23 = vstv %s2362_s19  ;;  %v2382_v62 = vstv %s2359_s9  ;;  %s851_s11 = sshll.u32 %s1052_s12, 4  ;;  %s852_s11 = int_to_ptr.vmem [resolvable:$true] %s851_s11 }
 0x112   :  { %v435_v26 = vadd.f32 %v433_v44, %v398_v57  ;;  %v470_v18 = vmul.f32 %v2381_v23, %v1408_v30  ;;  %v761_v16 = vmul.f32 %v2382_v62, %v1551_v9  ;;  %v582_v17 = vadd.f32 %v580_v0, %v545_v20  ;;  %s1010_s9 = scalar_lea.vmem %s852_s11, 512  ;;  %p1015_p0 = scmp.lt.s32.totalorder %s852_s11, %s852_s11 }
 0x113   :  { %v690_v63 = vstv %s1847_s24  ;;  %v726_v53 = vadd.f32 %v724_v12, %v689_v6  ;;  %v2383_v55 = vmov %v2374_v39  ;;  %v2384_v22 = vmov %v2375_v1  ;;  %p1011_p13 = scmp.ne.s32.totalorder %s852_s11, %s1010_s9  ;;  %p1016_p1 = scmp.lt.s32.totalorder %s1010_s9, %s1010_s9 }
 0x114   :  { %v472_v52 = vadd.f32 %v470_v18, %v435_v26  ;;  %v507_v39 = vmul.f32 %v2383_v55, %v1436_v33  ;;  %v544_v1 = vmul.f32 %v2384_v22, %v1438_v29  ;;  %v619_v58 = vadd.f32 %v617_v61, %v582_v17 }
 0x115   :  { %v654_v50 = vmul.f32 %v653_v45, %v1464_v25  ;;  %v763_v54 = vadd.f32 %v761_v16, %v726_v53  ;;  %v727_v48 = vstv %s1864_s28  ;;  %v691_v3 = vmul.f32 %v690_v63, %v1478_v8  ;;  %p1017_p2 = por %p1016_p1, %p1015_p0 }
 0x116   :  { %v509_v4 = vadd.f32 %v507_v39, %v472_v52  ;;  %v764_v15 = vstv %s1875_s23  ;;  %v581_v0 = vmul.f32 %v2378_v11, %v1480_v24  ;;  %v728_v10 = vmul.f32 %v727_v48, %v1496_v21 }
 0x117   :  { %v656_v28 = vadd.f32 %v654_v50, %v619_v58  ;;  %816 = vrot.lane.b32.xlu1 %v763_v54, %s1049_s26  ;;  %v618_v59 = vmul.f32 %v616_v5, %v1506_v27  ;;  %v765_v20 = vmul.f32 %v764_v15, %v1504_v35  ;;  %v655_v6 = vmul.f32 %v653_v45, %v1508_v13  ;;  %p1018_p3 = pnand %p1017_p2, %p1011_p13 }
 0x118   :  { %v546_v2 = vadd.f32 %v544_v1, %v509_v4  ;;  %v692_v26 = vmul.f32 %v690_v63, %v1525_v60  ;;  %v729_v18 = vmul.f32 %v727_v48, %v1546_v7  ;;  %v766_v16 = vmul.f32 %v764_v15, %v1551_v9 }
 0x119   :  { %v693_v43 = vadd.f32 %v691_v3, %v656_v28  ;;  %v290_v5 = vstv %s870_s18  ;;  %v253_v53 = vstv %s43_s27  ;;  %v327_v52 = vstv %s877_s20 }
 0x11a   :  { %v583_v57 = vadd.f32 %v581_v0, %v546_v2  ;;  %v291_v45 = vmul.f32 %v290_v5, %v1310_v37  ;;  %v254_v63 = vmul.f32 %v253_v53, %v1308_v32  ;;  %v328_v39 = vmul.f32 %v327_v52, %v1312_v49 }
 0x11b   :  { %v730_v44 = vadd.f32 %v728_v10, %v693_v43  ;;  %v364_v22 = vstv %s884_s15  ;;  %v292_v1 = vmul.f32 %v290_v5, %v1351_v41  ;;  %v255_v58 = vmul.f32 %v253_v53, %v1349_v19 }
 0x11c   :  { %v620_v61 = vadd.f32 %v618_v59, %v583_v57  ;;  %v293_v55 = vadd.f32 %v291_v45, %v254_v63  ;;  %v365_v54 = vmul.f32 %v364_v22, %v1332_v14  ;;  %v401_v32 = vstv %s891_s29 }
 0x11d   :  { %v767_v46 = vadd.f32 %v765_v20, %v730_v44  ;;  %v294_v37 = vadd.f32 %v292_v1, %v255_v58  ;;  %v329_v49 = vmul.f32 %v327_v52, %v1353_v40  ;;  %v402_v4 = vmul.f32 %v401_v32, %v1361_v42 }
 0x11e   :  { %v657_v12 = vadd.f32 %v655_v6, %v620_v61  ;;  %v330_v50 = vadd.f32 %v328_v39, %v293_v55  ;;  %v438_v28 = vstv %s1919_s2  ;;  %v366_v41 = vmul.f32 %v364_v22, %v1373_v51 }
 0x11f   :  { %824 = vrot.lane.b32.xlu0 %v767_v46, %s1050_s22  ;;  %v331_v3 = vadd.f32 %v329_v49, %v294_v37  ;;  %v439_v14 = vmul.f32 %v438_v28, %v1375_v38  ;;  %v475_v19 = vstv %s1924_s16  ;;  %v512_v0 = vstv %s912_s5 }
 0x120   :  { %v694_v23 = vadd.f32 %v692_v26, %v657_v12  ;;  %v367_v48 = vadd.f32 %v365_v54, %v330_v50  ;;  %v403_v40 = vmul.f32 %v401_v32, %v1395_v36  ;;  %v476_v42 = vmul.f32 %v475_v19, %v1388_v34 }
 0x121   :  { %v368_v2 = vadd.f32 %v366_v41, %v331_v3  ;;  %v513_v10 = vmul.f32 %v512_v0, %v1413_v31  ;;  %v549_v59 = vstv %s1929_s7  ;;  %v440_v51 = vmul.f32 %v438_v28, %v1408_v30 }
 0x122   :  { %v731_v62 = vadd.f32 %v729_v18, %v694_v23  ;;  %v404_v15 = vadd.f32 %v402_v4, %v367_v48  ;;  %v550_v44 = vmul.f32 %v549_v59, %v1415_v56  ;;  %v586_v61 = vstv %s1934_s1 }
 0x123   :  { %v405_v43 = vadd.f32 %v403_v40, %v368_v2  ;;  %v477_v6 = vmul.f32 %v475_v19, %v1436_v33  ;;  %v514_v36 = vmul.f32 %v512_v0, %v1438_v29  ;;  %v587_v34 = vmul.f32 %v586_v61, %v1425_v47 }
 0x124   :  { %v768_v17 = vadd.f32 %v766_v16, %v731_v62  ;;  %v441_v11 = vadd.f32 %v439_v14, %v404_v15  ;;  %v623_v31 = vstv %s933_s3  ;;  %v551_v56 = vmul.f32 %v549_v59, %v1480_v24 }
 0x125   :  { %v442_v38 = vadd.f32 %v440_v51, %v405_v43  ;;  %v624_v18 = vmul.f32 %v623_v31, %v1464_v25  ;;  %v660_v33 = vstv %s940_s10  ;;  %v588_v29 = vmul.f32 %v586_v61, %v1506_v27 }
 0x126   :  { %826 = vrot.lane.b32.xlu1 %v768_v17, %s1050_s22  ;;  %v478_v57 = vadd.f32 %v476_v42, %v441_v11  ;;  %v661_v47 = vmul.f32 %v660_v33, %v1478_v8  ;;  %v697_v17 = vstv %s1946_s0  ;;  %v625_v52 = vmul.f32 %v623_v31, %v1508_v13 }
 0x127   :  { %v479_v46 = vadd.f32 %v477_v6, %v442_v38  ;;  %v698_v55 = vmul.f32 %v697_v17, %v1496_v21  ;;  %v734_v24 = vstv %s954_s8  ;;  %v662_v22 = vmul.f32 %v660_v33, %v1525_v60 }
 0x128   :  { %v515_v20 = vadd.f32 %v513_v10, %v478_v57  ;;  %v735_v58 = vmul.f32 %v734_v24, %v1504_v35  ;;  %v769_v54 = vstv %s2385_s17  ;;  %v699_v32 = vmul.f32 %v697_v17, %v1546_v7 }
 0x129   :  { %v516_v30 = vadd.f32 %v514_v36, %v479_v46  ;;  %v736_v49 = vmul.f32 %v734_v24, %v1551_v9 }
 0x12a   :  { %v552_v12 = vadd.f32 %v550_v44, %v515_v20 }
 0x12b   :  { %v553_v62 = vadd.f32 %v551_v56, %v516_v30 }
 0x12c   :  { %v589_v26 = vadd.f32 %v587_v34, %v552_v12 }
 0x12d   :  { %v590_v5 = vadd.f32 %v588_v29, %v553_v62 }
 0x12e   :  { %v626_v16 = vadd.f32 %v624_v18, %v589_v26 }
 0x12f   :  { %v627_v39 = vadd.f32 %v625_v52, %v590_v5 }
 0x130   :  { %v663_v45 = vadd.f32 %v661_v47, %v626_v16 }
 0x131   :  { %v664_v50 = vadd.f32 %v662_v22, %v627_v39 }
 0x132   :  { %v700_v25 = vadd.f32 %v698_v55, %v663_v45 }
 0x133   :  { %v701_v13 = vadd.f32 %v699_v32, %v664_v50 }
 0x134   :  { %v737_v8 = vadd.f32 %v735_v58, %v700_v25 }
 0x135   :  { %v738_v60 = vadd.f32 %v736_v49, %v701_v13 }
 0x136   :  { %v770_v21 = vadd.f32 %v769_v54, %v737_v8 }
 0x137   :  { %v771_v41 = vadd.f32 %v769_v54, %v738_v60 }
 0x13c   :  { %v775_v23 = vpop.permute.xlu0 %774 }
 0x13d   :  { %v780_v4 = vadd.f32 %v775_v23, %v770_v21 }
 0x140   :  { %v785_v53 = vpop.permute.xlu0 %784 }
 0x141   :  { %v777_v63 = vpop.permute.xlu1 %776  ;;  %v790_v28 = vadd.f32 %v785_v53, %v780_v4 }
 0x142   :  { %v781_v19 = vadd.f32 %v777_v63, %v771_v41 }
 0x151   :  { %v787_v27 = vpop.permute.xlu1 %786 }
 0x152   :  { %v791_v11 = vadd.f32 %v787_v27, %v781_v19 }
 0x158   :  { %v795_v1 = vpop.permute.xlu0 %794 }
 0x159   :  { %v800_v35 = vadd.f32 %v795_v1, %v790_v28 }
 0x166   :  { %v797_v48 = vpop.permute.xlu1 %796 }
 0x167   :  { %v801_v42 = vadd.f32 %v797_v48, %v791_v11 }
 0x16b   :  { %v805_v37 = vpop.permute.xlu0 %804 }
 0x16c   :  { %v810_v14 = vadd.f32 %v805_v37, %v800_v35 }
 0x178   :  { %v807_v15 = vpop.permute.xlu1 %806 }
 0x179   :  { %v811_v9 = vadd.f32 %v807_v15, %v801_v42 }
 0x181   :  { %v815_v3 = vpop.permute.xlu0 %814 }
 0x182   :  { %v820_v2 = vadd.f32 %v815_v3, %v810_v14 }
 0x189   :  { %v817_v7 = vpop.permute.xlu1 %816 }
 0x18a   :  { %v821_v43 = vadd.f32 %v817_v7, %v811_v9 }
 0x191   :  { %v825_v0 = vpop.permute.xlu0 %824 }
 0x192   :  { %v830_v40 = vadd.f32 %v825_v0, %v820_v2 }
 0x194   :  { %833 = vst.msk [vmem:[#allocation9] sm:$0xff] %vm832_vm3, %v830_v40  ;;  %837 = vrot.lane.b32.xlu0 %v830_v40, %s1051_s6 }
 0x198   :  { %v827_v10 = vpop.permute.xlu1 %826 }
 0x199   :  { %v831_v57 = vadd.f32 %v827_v10, %v821_v43 }
 0x19b   :  { %834 = vst.msk [vmem:[#allocation9 + $0x8] sm:$0xff] %vm832_vm3, %v831_v57  ;;  %839 = vrot.lane.b32.xlu1 %v831_v57, %s1051_s6 }
 0x206   :  { %v838_v59 = vpop.permute.xlu0 %837 }
 0x207   :  { %844 = vst.msk [vmem:[#allocation9 + $0x10] sm:$0xff] %vm832_vm3, %v838_v59 }
 0x20d   :  { %v840_v51 = vpop.permute.xlu1 %839 }
 0x20e   :  { %845 = vst.msk [vmem:[#allocation9 + $0x18] sm:$0xff] %vm832_vm3, %v840_v51 }
 0x20f   :  { %1021 = shalt.err (!%p1018_p3)
}
 0x210   :  { %s2386_s13 = sld [smem:[#allocation77_spill]] }
 0x216   :  { %s1022_s4 = scalar_lea.hbm %s2386_s13, 512 }
 0x217   :  { %p1023_p4 = scmp.ne.s32.totalorder %s2386_s13, %s1022_s4  ;;  %p1026_p5 = scmp.lt.u32.totalorder %s1022_s4, %s2386_s13 }
 0x219   :  { %p1028_p6 = pnand %p1026_p5, %p1023_p4 }
 0x21b   :  { %1031 = shalt.err (!%p1028_p6)
}
 0x21c   :  { %s2387_s26 = smov 8   ;;  %s2388_s22 = smov 128  }
 0x21d   :  { %857 = dma.vmem_to_hbm [thread:$0]  %s852_s11, 512, %s2386_s13, [#allocation6], %s2388_s22, %s2388_s22, %s2387_s26  }
 0x21e   :  { %1036 = dma.done.wait [#allocation6], 512  }
 0x21f   :  { %1037 = vsyncadd [#allocation6], 4294966784 }
 0x220   :  { %861 = vsyncpa [#allocation5], 1 }
 0x221   :  { %862 = vsyncpa [#allocation6], 1 }
 0x222   :  { %863 = vsyncpa [#allocation7], 1 }

</bundles_post_ra>
